<compile_context>
chip_gen: v7x
topology: tpu7x:2x2x1
jax: 0.10.0
libtpu: 0.0.40
codegen_flags: <defaults>
</compile_context>

<pallas_src>
import jax
import jax.numpy as jnp
import numpy as np
from jax import lax
from jax.experimental import pallas as pl
from jax.experimental.pallas import tpu as pltpu

# ---------------- model dims (small synthetic) ----------------
B = 2          # batch                         (b in x.view(b, s, w, -1))
S = 4          # sentences per batch element   (s)
W = 2          # words per sentence            (w) -- max is taken over this
T = S * W      # GRU sequence length
D_IN = 16      # input_length  (GRU input feature size)
H = 32         # target_length == hidden_dim (GRU hidden size)
N_OUT = 6      # final number of classes


# --------------------------------------------------------------------------
# Fused kernel: bidirectional GRU + max-over-w + Linear/ReLU + Linear/Sigmoid
# Fused gate/column layout (width 6H): [r_f | r_b | z_f | z_b | n_f | n_b]
# --------------------------------------------------------------------------
def grunet_kernel(x_ref, wi_ref, bi_ref, wh_ref, bhn_ref,
                  w1_ref, b1_ref, w2_ref, b2_ref, out_ref):
    H2 = 2 * H
    # x_ref: (B*T, D) in native batch-major row order (row = b*T + t).
    x = x_ref[...]

    # Hoisted input projections (off the serial chain).  wi[0] carries the fwd
    # weights in the fwd gate columns (bwd columns zero), wi[1] the converse,
    # so the two projections can simply be added after time-alignment.
    # b_ir+b_hr and b_iz+b_hz are already folded into bi at init time.
    xp_f = jnp.dot(x, wi_ref[0], preferred_element_type=jnp.float32) + bi_ref[0]
    xp_b = jnp.dot(x, wi_ref[1], preferred_element_type=jnp.float32) + bi_ref[1]

    wh = wh_ref[...]                                     # (2H, 6H) block-diag
    bhn = jnp.broadcast_to(bhn_ref[...], (B, H2))        # hoisted: one broadcast

    def rows_at(xp, t):
        # Gather the B rows of time step t out of the batch-major projection.
        return jnp.concatenate(
            [xp[b * T + t: b * T + t + 1, :] for b in range(B)], axis=0)

    # Per-step fused input pre-activations: fwd half reads time k, bwd half
    # reads time T-1-k.  Independent of h -> not on the recurrence chain.
    gi = [rows_at(xp_f, k) + rows_at(xp_b, T - 1 - k) for k in range(T)]

    maxf = [None] * S   # running max of fwd outputs per sentence, each (B, H)
    maxb = [None] * S   # running max of bwd outputs per sentence, each (B, H)
    h = None            # fused hidden state (B, 2H)

    for k in range(T):                                   # fully unrolled, T=8
        g = gi[k]
        if k == 0:
            # h0 == 0  =>  h @ wh == 0: skip the first matmul entirely.
            r = jax.nn.sigmoid(g[:, 0:H2])
            z = jax.nn.sigmoid(g[:, H2:2 * H2])
            n = jnp.tanh(g[:, 2 * H2:3 * H2] + r * bhn)
            h = (1.0 - z) * n
        else:
            gh = jnp.dot(h, wh, preferred_element_type=jnp.float32)
            r = jax.nn.sigmoid(g[:, 0:H2] + gh[:, 0:H2])
            z = jax.nn.sigmoid(g[:, H2:2 * H2] + gh[:, H2:2 * H2])
            n = jnp.tanh(g[:, 2 * H2:3 * H2] + r * (gh[:, 2 * H2:3 * H2] + bhn))
            h = (1.0 - z) * n + z * h                    # PyTorch GRU update

        # Running max over words (off the recurrence critical path).
        hf = h[:, 0:H]                                   # fwd output at t = k
        hb = h[:, H:H2]                                  # bwd output at t = T-1-k
        sf = k // W
        sb = (T - 1 - k) // W
        maxf[sf] = hf if maxf[sf] is None else jnp.maximum(maxf[sf], hf)
        maxb[sb] = hb if maxb[sb] is None else jnp.maximum(maxb[sb], hb)

    # Head input assembled as a value, rows already in (b, s) order so the
    # wrapper-side reshape to (B, S, 6) is a free contiguous reshape.
    rows = []
    for b in range(B):
        for s in range(S):
            rows.append(jnp.concatenate(
                [maxf[s][b:b + 1, :], maxb[s][b:b + 1, :]], axis=-1))  # (1, 2H)
    xm = jnp.concatenate(rows, axis=0)                   # (B*S, 2H)

    h1 = jnp.dot(xm, w1_ref[...], preferred_element_type=jnp.float32) + b1_ref[...]
    h1 = jnp.maximum(h1, 0.0)                            # relu
    logits = jnp.dot(h1, w2_ref[...], preferred_element_type=jnp.float32) + b2_ref[...]
    out_ref[...] = jax.nn.sigmoid(logits)                # (B*S, 6)


# --------------------------------------------------------------------------
# Full forward pass (both reshapes are free contiguous-view reshapes)
# --------------------------------------------------------------------------
def grunet_forward(x_btd, fp):
    x_rows = x_btd.reshape(B * T, D_IN)                  # row = b*T + t, no transpose
    out = pl.pallas_call(
        grunet_kernel,
        out_shape=jax.ShapeDtypeStruct((B * S, N_OUT), jnp.float32),
    )(x_rows, fp["wi"], fp["bi"], fp["wh"], fp["bhn"],
      fp["w1"], fp["b1"], fp["w2"], fp["b2"])
    return out.reshape(B, S, N_OUT)                      # rows are (b, s) ordered


# --------------------------------------------------------------------------
# Deterministic parameter init (per-direction [r|z|n] layout, as PyTorch)
# --------------------------------------------------------------------------
def init_params(key):
    k = 1.0 / np.sqrt(H)
    keys = jax.random.split(key, 8)
    u = lambda kk, shape, lim: jax.random.uniform(kk, shape, jnp.float32, -lim, lim)
    p = {}
    p["wi"] = u(keys[0], (2, D_IN, 3 * H), k)   # W_ih per direction
    p["wh"] = u(keys[1], (2, H, 3 * H), k)      # W_hh per direction
    p["bi"] = u(keys[2], (2, 1, 3 * H), k)      # b_ih
    p["bh"] = u(keys[3], (2, 1, 3 * H), k)      # b_hh (b_hn stays inside r*(.))
    k1 = 1.0 / np.sqrt(2 * H)
    p["w1"] = u(keys[4], (2 * H, H), k1)        # l1: Linear(2H -> H)
    p["b1"] = u(keys[5], (1, H), k1)
    k2 = 1.0 / np.sqrt(H)
    p["w2"] = u(keys[6], (H, N_OUT), k2)        # l2: Linear(H -> 6)
    p["b2"] = u(keys[7], (1, N_OUT), k2)
    return p


def fuse_params(p):
    """Build fused kernel params: block-diagonal hidden weight, direction-
    expanded input weights, and r/z hidden biases folded into the input bias.
    Fused column layout: [r_f | r_b | z_f | z_b | n_f | n_b] (each H wide)."""
    wi = jnp.zeros((2, D_IN, 6 * H), jnp.float32)
    bi = jnp.zeros((2, 1, 6 * H), jnp.float32)
    wh = jnp.zeros((2 * H, 6 * H), jnp.float32)
    for d in range(2):                        # 0 = forward, 1 = backward
        for g in range(3):                    # 0 = r, 1 = z, 2 = n
            col = 2 * g * H + d * H           # destination column block
            src = slice(g * H, (g + 1) * H)
            wi = wi.at[d, :, col:col + H].set(p["wi"][d][:, src])
            b = p["bi"][d][:, src]
            if g < 2:                         # fold b_hr / b_hz into input bias
                b = b + p["bh"][d][:, src]
            bi = bi.at[d, :, col:col + H].set(b)
            wh = wh.at[d * H:(d + 1) * H, col:col + H].set(p["wh"][d][:, src])
    bhn = jnp.concatenate([p["bh"][0][:, 2 * H:3 * H],
                           p["bh"][1][:, 2 * H:3 * H]], axis=-1)   # (1, 2H)
    return {"wi": wi, "bi": bi, "wh": wh, "bhn": bhn,
            "w1": p["w1"], "b1": p["b1"], "w2": p["w2"], "b2": p["b2"]}


# --------------------------------------------------------------------------
# Pure-JAX reference (uses the unfused per-direction params)
# --------------------------------------------------------------------------
def grunet_reference(x_btd, p):
    x_tbd = jnp.transpose(x_btd, (1, 0, 2))  # (T, B, D)

    def run_dir(xs, d):
        def step(h, xt):
            gi = xt @ p["wi"][d] + p["bi"][d, 0]
            gh = h @ p["wh"][d] + p["bh"][d, 0]
            r = jax.nn.sigmoid(gi[:, 0:H] + gh[:, 0:H])
            z = jax.nn.sigmoid(gi[:, H:2 * H] + gh[:, H:2 * H])
            n = jnp.tanh(gi[:, 2 * H:] + r * gh[:, 2 * H:])
            hn = (1.0 - z) * n + z * h
            return hn, hn
        h0 = jnp.zeros((xs.shape[1], H), jnp.float32)
        _, hs = lax.scan(step, h0, xs)
        return hs

    fwd = run_dir(x_tbd, 0)
    bwd = run_dir(x_tbd[::-1], 1)[::-1]
    out = jnp.concatenate([fwd, bwd], axis=-1)     # (T, B, 2H)
    out = jnp.transpose(out, (1, 0, 2))            # (B, T, 2H)
    xm = jnp.max(out.reshape(B, S, W, 2 * H), axis=2)
    h1 = jax.nn.relu(xm @ p["w1"] + p["b1"])
    return jax.nn.sigmoid(h1 @ p["w2"] + p["b2"])


if __name__ == "__main__":
    key = jax.random.PRNGKey(0)
    kp, kx = jax.random.split(key)
    params = init_params(kp)
    fused = fuse_params(params)
    x = jax.random.normal(kx, (B, T, D_IN), jnp.float32)

    out = jax.jit(grunet_forward)(x, fused)
    out = jax.block_until_ready(out)
    assert out.shape == (B, S, N_OUT)

    ref = grunet_reference(x, params)
    # f32 everywhere; slight reassociation from bias folding / block-diag matmul.
    if not np.allclose(np.asarray(out), np.asarray(ref), atol=5e-5, rtol=5e-5):
        raise AssertionError("Pallas output mismatch vs JAX reference")

    print("KERNEL_OK")
</pallas_src>

<mosaic_0001>
module attributes {stable_mosaic.version = 11 : i64} {
  func.func @grunet_kernel(%arg0: memref<16x16xf32, #tpu.memory_space<vmem>>, %arg1: memref<2x16x192xf32, #tpu.memory_space<vmem>>, %arg2: memref<2x1x192xf32, #tpu.memory_space<vmem>>, %arg3: memref<64x192xf32, #tpu.memory_space<vmem>>, %arg4: memref<1x64xf32, #tpu.memory_space<vmem>>, %arg5: memref<64x32xf32, #tpu.memory_space<vmem>>, %arg6: memref<1x32xf32, #tpu.memory_space<vmem>>, %arg7: memref<32x6xf32, #tpu.memory_space<vmem>>, %arg8: memref<1x6xf32, #tpu.memory_space<vmem>>, %arg9: memref<8x6xf32, #tpu.memory_space<vmem>>) attributes {dimension_semantics = [], scalar_prefetch = 0 : i64, scratch_operands = 0 : i64, tpu.core_type = #tpu.core_type<tc>} {
    %c0 = arith.constant 0 : index
    %c0_0 = arith.constant 0 : index
    %0 = vector.load %arg0[%c0, %c0_0] : memref<16x16xf32, #tpu.memory_space<vmem>>, vector<16x16xf32>
    %c0_1 = arith.constant 0 : index
    %c0_2 = arith.constant 0 : index
    %c0_3 = arith.constant 0 : index
    %1 = vector.load %arg1[%c0_1, %c0_2, %c0_3] : memref<2x16x192xf32, #tpu.memory_space<vmem>>, vector<1x16x192xf32>
    %2 = vector.shape_cast %1 : vector<1x16x192xf32> to vector<16x192xf32>
    %cst = arith.constant dense<0.000000e+00> : vector<16x192xf32>
    %3 = tpu.matmul %0, %2, %cst {dimension_numbers = #tpu.dot_dimension_numbers<[1], [0], [0], [1], [0, 0, 1, 1], [], []>} : vector<16x16xf32>, vector<16x192xf32>, vector<16x192xf32> -> vector<16x192xf32>
    %c0_4 = arith.constant 0 : index
    %c0_5 = arith.constant 0 : index
    %c0_6 = arith.constant 0 : index
    %4 = vector.load %arg2[%c0_4, %c0_5, %c0_6] : memref<2x1x192xf32, #tpu.memory_space<vmem>>, vector<1x1x192xf32>
    %5 = vector.shape_cast %4 : vector<1x1x192xf32> to vector<1x192xf32>
    %6 = vector.broadcast %5 : vector<1x192xf32> to vector<16x192xf32>
    %7 = arith.addf %3, %6 : vector<16x192xf32>
    %c1 = arith.constant 1 : index
    %c0_7 = arith.constant 0 : index
    %c0_8 = arith.constant 0 : index
    %8 = vector.load %arg1[%c1, %c0_7, %c0_8] : memref<2x16x192xf32, #tpu.memory_space<vmem>>, vector<1x16x192xf32>
    %9 = vector.shape_cast %8 : vector<1x16x192xf32> to vector<16x192xf32>
    %cst_9 = arith.constant dense<0.000000e+00> : vector<16x192xf32>
    %10 = tpu.matmul %0, %9, %cst_9 {dimension_numbers = #tpu.dot_dimension_numbers<[1], [0], [0], [1], [0, 0, 1, 1], [], []>} : vector<16x16xf32>, vector<16x192xf32>, vector<16x192xf32> -> vector<16x192xf32>
    %c1_10 = arith.constant 1 : index
    %c0_11 = arith.constant 0 : index
    %c0_12 = arith.constant 0 : index
    %11 = vector.load %arg2[%c1_10, %c0_11, %c0_12] : memref<2x1x192xf32, #tpu.memory_space<vmem>>, vector<1x1x192xf32>
    %12 = vector.shape_cast %11 : vector<1x1x192xf32> to vector<1x192xf32>
    %13 = vector.broadcast %12 : vector<1x192xf32> to vector<16x192xf32>
    %14 = arith.addf %10, %13 : vector<16x192xf32>
    %c0_13 = arith.constant 0 : index
    %c0_14 = arith.constant 0 : index
    %15 = vector.load %arg3[%c0_13, %c0_14] : memref<64x192xf32, #tpu.memory_space<vmem>>, vector<64x192xf32>
    %c0_15 = arith.constant 0 : index
    %c0_16 = arith.constant 0 : index
    %16 = vector.load %arg4[%c0_15, %c0_16] : memref<1x64xf32, #tpu.memory_space<vmem>>, vector<1x64xf32>
    %17 = vector.shape_cast %16 : vector<1x64xf32> to vector<1x64xf32>
    %18 = vector.broadcast %17 : vector<1x64xf32> to vector<2x64xf32>
    %19 = vector.extract_strided_slice %7 {offsets = [0, 0], sizes = [1, 192], strides = [1, 1]} : vector<16x192xf32> to vector<1x192xf32>
    %20 = vector.extract_strided_slice %7 {offsets = [8, 0], sizes = [1, 192], strides = [1, 1]} : vector<16x192xf32> to vector<1x192xf32>
    %21 = tpu.concatenate %19, %20 in 0 : vector<1x192xf32>, vector<1x192xf32> -> vector<2x192xf32>
    %22 = vector.extract_strided_slice %14 {offsets = [7, 0], sizes = [1, 192], strides = [1, 1]} : vector<16x192xf32> to vector<1x192xf32>
    %23 = vector.extract_strided_slice %14 {offsets = [15, 0], sizes = [1, 192], strides = [1, 1]} : vector<16x192xf32> to vector<1x192xf32>
    %24 = tpu.concatenate %22, %23 in 0 : vector<1x192xf32>, vector<1x192xf32> -> vector<2x192xf32>
    %25 = arith.addf %21, %24 : vector<2x192xf32>
    %26 = vector.extract_strided_slice %7 {offsets = [1, 0], sizes = [1, 192], strides = [1, 1]} : vector<16x192xf32> to vector<1x192xf32>
    %27 = vector.extract_strided_slice %7 {offsets = [9, 0], sizes = [1, 192], strides = [1, 1]} : vector<16x192xf32> to vector<1x192xf32>
    %28 = tpu.concatenate %26, %27 in 0 : vector<1x192xf32>, vector<1x192xf32> -> vector<2x192xf32>
    %29 = vector.extract_strided_slice %14 {offsets = [6, 0], sizes = [1, 192], strides = [1, 1]} : vector<16x192xf32> to vector<1x192xf32>
    %30 = vector.extract_strided_slice %14 {offsets = [14, 0], sizes = [1, 192], strides = [1, 1]} : vector<16x192xf32> to vector<1x192xf32>
    %31 = tpu.concatenate %29, %30 in 0 : vector<1x192xf32>, vector<1x192xf32> -> vector<2x192xf32>
    %32 = arith.addf %28, %31 : vector<2x192xf32>
    %33 = vector.extract_strided_slice %7 {offsets = [2, 0], sizes = [1, 192], strides = [1, 1]} : vector<16x192xf32> to vector<1x192xf32>
    %34 = vector.extract_strided_slice %7 {offsets = [10, 0], sizes = [1, 192], strides = [1, 1]} : vector<16x192xf32> to vector<1x192xf32>
    %35 = tpu.concatenate %33, %34 in 0 : vector<1x192xf32>, vector<1x192xf32> -> vector<2x192xf32>
    %36 = vector.extract_strided_slice %14 {offsets = [5, 0], sizes = [1, 192], strides = [1, 1]} : vector<16x192xf32> to vector<1x192xf32>
    %37 = vector.extract_strided_slice %14 {offsets = [13, 0], sizes = [1, 192], strides = [1, 1]} : vector<16x192xf32> to vector<1x192xf32>
    %38 = tpu.concatenate %36, %37 in 0 : vector<1x192xf32>, vector<1x192xf32> -> vector<2x192xf32>
    %39 = arith.addf %35, %38 : vector<2x192xf32>
    %40 = vector.extract_strided_slice %7 {offsets = [3, 0], sizes = [1, 192], strides = [1, 1]} : vector<16x192xf32> to vector<1x192xf32>
    %41 = vector.extract_strided_slice %7 {offsets = [11, 0], sizes = [1, 192], strides = [1, 1]} : vector<16x192xf32> to vector<1x192xf32>
    %42 = tpu.concatenate %40, %41 in 0 : vector<1x192xf32>, vector<1x192xf32> -> vector<2x192xf32>
    %43 = vector.extract_strided_slice %14 {offsets = [4, 0], sizes = [1, 192], strides = [1, 1]} : vector<16x192xf32> to vector<1x192xf32>
    %44 = vector.extract_strided_slice %14 {offsets = [12, 0], sizes = [1, 192], strides = [1, 1]} : vector<16x192xf32> to vector<1x192xf32>
    %45 = tpu.concatenate %43, %44 in 0 : vector<1x192xf32>, vector<1x192xf32> -> vector<2x192xf32>
    %46 = arith.addf %42, %45 : vector<2x192xf32>
    %47 = vector.extract_strided_slice %7 {offsets = [4, 0], sizes = [1, 192], strides = [1, 1]} : vector<16x192xf32> to vector<1x192xf32>
    %48 = vector.extract_strided_slice %7 {offsets = [12, 0], sizes = [1, 192], strides = [1, 1]} : vector<16x192xf32> to vector<1x192xf32>
    %49 = tpu.concatenate %47, %48 in 0 : vector<1x192xf32>, vector<1x192xf32> -> vector<2x192xf32>
    %50 = vector.extract_strided_slice %14 {offsets = [3, 0], sizes = [1, 192], strides = [1, 1]} : vector<16x192xf32> to vector<1x192xf32>
    %51 = vector.extract_strided_slice %14 {offsets = [11, 0], sizes = [1, 192], strides = [1, 1]} : vector<16x192xf32> to vector<1x192xf32>
    %52 = tpu.concatenate %50, %51 in 0 : vector<1x192xf32>, vector<1x192xf32> -> vector<2x192xf32>
    %53 = arith.addf %49, %52 : vector<2x192xf32>
    %54 = vector.extract_strided_slice %7 {offsets = [5, 0], sizes = [1, 192], strides = [1, 1]} : vector<16x192xf32> to vector<1x192xf32>
    %55 = vector.extract_strided_slice %7 {offsets = [13, 0], sizes = [1, 192], strides = [1, 1]} : vector<16x192xf32> to vector<1x192xf32>
    %56 = tpu.concatenate %54, %55 in 0 : vector<1x192xf32>, vector<1x192xf32> -> vector<2x192xf32>
    %57 = vector.extract_strided_slice %14 {offsets = [2, 0], sizes = [1, 192], strides = [1, 1]} : vector<16x192xf32> to vector<1x192xf32>
    %58 = vector.extract_strided_slice %14 {offsets = [10, 0], sizes = [1, 192], strides = [1, 1]} : vector<16x192xf32> to vector<1x192xf32>
    %59 = tpu.concatenate %57, %58 in 0 : vector<1x192xf32>, vector<1x192xf32> -> vector<2x192xf32>
    %60 = arith.addf %56, %59 : vector<2x192xf32>
    %61 = vector.extract_strided_slice %7 {offsets = [6, 0], sizes = [1, 192], strides = [1, 1]} : vector<16x192xf32> to vector<1x192xf32>
    %62 = vector.extract_strided_slice %7 {offsets = [14, 0], sizes = [1, 192], strides = [1, 1]} : vector<16x192xf32> to vector<1x192xf32>
    %63 = tpu.concatenate %61, %62 in 0 : vector<1x192xf32>, vector<1x192xf32> -> vector<2x192xf32>
    %64 = vector.extract_strided_slice %14 {offsets = [1, 0], sizes = [1, 192], strides = [1, 1]} : vector<16x192xf32> to vector<1x192xf32>
    %65 = vector.extract_strided_slice %14 {offsets = [9, 0], sizes = [1, 192], strides = [1, 1]} : vector<16x192xf32> to vector<1x192xf32>
    %66 = tpu.concatenate %64, %65 in 0 : vector<1x192xf32>, vector<1x192xf32> -> vector<2x192xf32>
    %67 = arith.addf %63, %66 : vector<2x192xf32>
    %68 = vector.extract_strided_slice %7 {offsets = [7, 0], sizes = [1, 192], strides = [1, 1]} : vector<16x192xf32> to vector<1x192xf32>
    %69 = vector.extract_strided_slice %7 {offsets = [15, 0], sizes = [1, 192], strides = [1, 1]} : vector<16x192xf32> to vector<1x192xf32>
    %70 = tpu.concatenate %68, %69 in 0 : vector<1x192xf32>, vector<1x192xf32> -> vector<2x192xf32>
    %71 = vector.extract_strided_slice %14 {offsets = [0, 0], sizes = [1, 192], strides = [1, 1]} : vector<16x192xf32> to vector<1x192xf32>
    %72 = vector.extract_strided_slice %14 {offsets = [8, 0], sizes = [1, 192], strides = [1, 1]} : vector<16x192xf32> to vector<1x192xf32>
    %73 = tpu.concatenate %71, %72 in 0 : vector<1x192xf32>, vector<1x192xf32> -> vector<2x192xf32>
    %74 = arith.addf %70, %73 : vector<2x192xf32>
    %75 = vector.extract_strided_slice %25 {offsets = [0, 0], sizes = [2, 64], strides = [1, 1]} : vector<2x192xf32> to vector<2x64xf32>
    %76 = arith.negf %75 : vector<2x64xf32>
    %77 = math.exp %76 : vector<2x64xf32>
    %cst_17 = arith.constant 1.000000e+00 : f32
    %78 = vector.broadcast %cst_17 : f32 to vector<2x64xf32>
    %79 = arith.addf %78, %77 : vector<2x64xf32>
    %80 = arith.divf %78, %79 : vector<2x64xf32>
    %81 = vector.extract_strided_slice %25 {offsets = [0, 64], sizes = [2, 64], strides = [1, 1]} : vector<2x192xf32> to vector<2x64xf32>
    %82 = arith.negf %81 : vector<2x64xf32>
    %83 = math.exp %82 : vector<2x64xf32>
    %cst_18 = arith.constant 1.000000e+00 : f32
    %84 = vector.broadcast %cst_18 : f32 to vector<2x64xf32>
    %85 = arith.addf %84, %83 : vector<2x64xf32>
    %86 = arith.divf %84, %85 : vector<2x64xf32>
    %87 = vector.extract_strided_slice %25 {offsets = [0, 128], sizes = [2, 64], strides = [1, 1]} : vector<2x192xf32> to vector<2x64xf32>
    %88 = arith.mulf %80, %18 : vector<2x64xf32>
    %89 = arith.addf %87, %88 : vector<2x64xf32>
    %90 = math.tanh %89 : vector<2x64xf32>
    %cst_19 = arith.constant 1.000000e+00 : f32
    %91 = vector.broadcast %cst_19 : f32 to vector<2x64xf32>
    %92 = arith.subf %91, %86 : vector<2x64xf32>
    %93 = arith.mulf %92, %90 : vector<2x64xf32>
    %94 = vector.extract_strided_slice %93 {offsets = [0, 0], sizes = [2, 32], strides = [1, 1]} : vector<2x64xf32> to vector<2x32xf32>
    %95 = vector.extract_strided_slice %93 {offsets = [0, 32], sizes = [2, 32], strides = [1, 1]} : vector<2x64xf32> to vector<2x32xf32>
    %cst_20 = arith.constant dense<0.000000e+00> : vector<2x192xf32>
    %96 = tpu.matmul %93, %15, %cst_20 {dimension_numbers = #tpu.dot_dimension_numbers<[1], [0], [0], [1], [0, 0, 1, 1], [], []>} : vector<2x64xf32>, vector<64x192xf32>, vector<2x192xf32> -> vector<2x192xf32>
    %97 = vector.extract_strided_slice %32 {offsets = [0, 0], sizes = [2, 64], strides = [1, 1]} : vector<2x192xf32> to vector<2x64xf32>
    %98 = vector.extract_strided_slice %96 {offsets = [0, 0], sizes = [2, 64], strides = [1, 1]} : vector<2x192xf32> to vector<2x64xf32>
    %99 = arith.addf %97, %98 : vector<2x64xf32>
    %100 = arith.negf %99 : vector<2x64xf32>
    %101 = math.exp %100 : vector<2x64xf32>
    %cst_21 = arith.constant 1.000000e+00 : f32
    %102 = vector.broadcast %cst_21 : f32 to vector<2x64xf32>
    %103 = arith.addf %102, %101 : vector<2x64xf32>
    %104 = arith.divf %102, %103 : vector<2x64xf32>
    %105 = vector.extract_strided_slice %32 {offsets = [0, 64], sizes = [2, 64], strides = [1, 1]} : vector<2x192xf32> to vector<2x64xf32>
    %106 = vector.extract_strided_slice %96 {offsets = [0, 64], sizes = [2, 64], strides = [1, 1]} : vector<2x192xf32> to vector<2x64xf32>
    %107 = arith.addf %105, %106 : vector<2x64xf32>
    %108 = arith.negf %107 : vector<2x64xf32>
    %109 = math.exp %108 : vector<2x64xf32>
    %cst_22 = arith.constant 1.000000e+00 : f32
    %110 = vector.broadcast %cst_22 : f32 to vector<2x64xf32>
    %111 = arith.addf %110, %109 : vector<2x64xf32>
    %112 = arith.divf %110, %111 : vector<2x64xf32>
    %113 = vector.extract_strided_slice %32 {offsets = [0, 128], sizes = [2, 64], strides = [1, 1]} : vector<2x192xf32> to vector<2x64xf32>
    %114 = vector.extract_strided_slice %96 {offsets = [0, 128], sizes = [2, 64], strides = [1, 1]} : vector<2x192xf32> to vector<2x64xf32>
    %115 = arith.addf %114, %18 : vector<2x64xf32>
    %116 = arith.mulf %104, %115 : vector<2x64xf32>
    %117 = arith.addf %113, %116 : vector<2x64xf32>
    %118 = math.tanh %117 : vector<2x64xf32>
    %cst_23 = arith.constant 1.000000e+00 : f32
    %119 = vector.broadcast %cst_23 : f32 to vector<2x64xf32>
    %120 = arith.subf %119, %112 : vector<2x64xf32>
    %121 = arith.mulf %120, %118 : vector<2x64xf32>
    %122 = arith.mulf %112, %93 : vector<2x64xf32>
    %123 = arith.addf %121, %122 : vector<2x64xf32>
    %124 = vector.extract_strided_slice %123 {offsets = [0, 0], sizes = [2, 32], strides = [1, 1]} : vector<2x64xf32> to vector<2x32xf32>
    %125 = vector.extract_strided_slice %123 {offsets = [0, 32], sizes = [2, 32], strides = [1, 1]} : vector<2x64xf32> to vector<2x32xf32>
    %126 = arith.maximumf %94, %124 : vector<2x32xf32>
    %127 = arith.maximumf %95, %125 : vector<2x32xf32>
    %cst_24 = arith.constant dense<0.000000e+00> : vector<2x192xf32>
    %128 = tpu.matmul %123, %15, %cst_24 {dimension_numbers = #tpu.dot_dimension_numbers<[1], [0], [0], [1], [0, 0, 1, 1], [], []>} : vector<2x64xf32>, vector<64x192xf32>, vector<2x192xf32> -> vector<2x192xf32>
    %129 = vector.extract_strided_slice %39 {offsets = [0, 0], sizes = [2, 64], strides = [1, 1]} : vector<2x192xf32> to vector<2x64xf32>
    %130 = vector.extract_strided_slice %128 {offsets = [0, 0], sizes = [2, 64], strides = [1, 1]} : vector<2x192xf32> to vector<2x64xf32>
    %131 = arith.addf %129, %130 : vector<2x64xf32>
    %132 = arith.negf %131 : vector<2x64xf32>
    %133 = math.exp %132 : vector<2x64xf32>
    %cst_25 = arith.constant 1.000000e+00 : f32
    %134 = vector.broadcast %cst_25 : f32 to vector<2x64xf32>
    %135 = arith.addf %134, %133 : vector<2x64xf32>
    %136 = arith.divf %134, %135 : vector<2x64xf32>
    %137 = vector.extract_strided_slice %39 {offsets = [0, 64], sizes = [2, 64], strides = [1, 1]} : vector<2x192xf32> to vector<2x64xf32>
    %138 = vector.extract_strided_slice %128 {offsets = [0, 64], sizes = [2, 64], strides = [1, 1]} : vector<2x192xf32> to vector<2x64xf32>
    %139 = arith.addf %137, %138 : vector<2x64xf32>
    %140 = arith.negf %139 : vector<2x64xf32>
    %141 = math.exp %140 : vector<2x64xf32>
    %cst_26 = arith.constant 1.000000e+00 : f32
    %142 = vector.broadcast %cst_26 : f32 to vector<2x64xf32>
    %143 = arith.addf %142, %141 : vector<2x64xf32>
    %144 = arith.divf %142, %143 : vector<2x64xf32>
    %145 = vector.extract_strided_slice %39 {offsets = [0, 128], sizes = [2, 64], strides = [1, 1]} : vector<2x192xf32> to vector<2x64xf32>
    %146 = vector.extract_strided_slice %128 {offsets = [0, 128], sizes = [2, 64], strides = [1, 1]} : vector<2x192xf32> to vector<2x64xf32>
    %147 = arith.addf %146, %18 : vector<2x64xf32>
    %148 = arith.mulf %136, %147 : vector<2x64xf32>
    %149 = arith.addf %145, %148 : vector<2x64xf32>
    %150 = math.tanh %149 : vector<2x64xf32>
    %cst_27 = arith.constant 1.000000e+00 : f32
    %151 = vector.broadcast %cst_27 : f32 to vector<2x64xf32>
    %152 = arith.subf %151, %144 : vector<2x64xf32>
    %153 = arith.mulf %152, %150 : vector<2x64xf32>
    %154 = arith.mulf %144, %123 : vector<2x64xf32>
    %155 = arith.addf %153, %154 : vector<2x64xf32>
    %156 = vector.extract_strided_slice %155 {offsets = [0, 0], sizes = [2, 32], strides = [1, 1]} : vector<2x64xf32> to vector<2x32xf32>
    %157 = vector.extract_strided_slice %155 {offsets = [0, 32], sizes = [2, 32], strides = [1, 1]} : vector<2x64xf32> to vector<2x32xf32>
    %cst_28 = arith.constant dense<0.000000e+00> : vector<2x192xf32>
    %158 = tpu.matmul %155, %15, %cst_28 {dimension_numbers = #tpu.dot_dimension_numbers<[1], [0], [0], [1], [0, 0, 1, 1], [], []>} : vector<2x64xf32>, vector<64x192xf32>, vector<2x192xf32> -> vector<2x192xf32>
    %159 = vector.extract_strided_slice %46 {offsets = [0, 0], sizes = [2, 64], strides = [1, 1]} : vector<2x192xf32> to vector<2x64xf32>
    %160 = vector.extract_strided_slice %158 {offsets = [0, 0], sizes = [2, 64], strides = [1, 1]} : vector<2x192xf32> to vector<2x64xf32>
    %161 = arith.addf %159, %160 : vector<2x64xf32>
    %162 = arith.negf %161 : vector<2x64xf32>
    %163 = math.exp %162 : vector<2x64xf32>
    %cst_29 = arith.constant 1.000000e+00 : f32
    %164 = vector.broadcast %cst_29 : f32 to vector<2x64xf32>
    %165 = arith.addf %164, %163 : vector<2x64xf32>
    %166 = arith.divf %164, %165 : vector<2x64xf32>
    %167 = vector.extract_strided_slice %46 {offsets = [0, 64], sizes = [2, 64], strides = [1, 1]} : vector<2x192xf32> to vector<2x64xf32>
    %168 = vector.extract_strided_slice %158 {offsets = [0, 64], sizes = [2, 64], strides = [1, 1]} : vector<2x192xf32> to vector<2x64xf32>
    %169 = arith.addf %167, %168 : vector<2x64xf32>
    %170 = arith.negf %169 : vector<2x64xf32>
    %171 = math.exp %170 : vector<2x64xf32>
    %cst_30 = arith.constant 1.000000e+00 : f32
    %172 = vector.broadcast %cst_30 : f32 to vector<2x64xf32>
    %173 = arith.addf %172, %171 : vector<2x64xf32>
    %174 = arith.divf %172, %173 : vector<2x64xf32>
    %175 = vector.extract_strided_slice %46 {offsets = [0, 128], sizes = [2, 64], strides = [1, 1]} : vector<2x192xf32> to vector<2x64xf32>
    %176 = vector.extract_strided_slice %158 {offsets = [0, 128], sizes = [2, 64], strides = [1, 1]} : vector<2x192xf32> to vector<2x64xf32>
    %177 = arith.addf %176, %18 : vector<2x64xf32>
    %178 = arith.mulf %166, %177 : vector<2x64xf32>
    %179 = arith.addf %175, %178 : vector<2x64xf32>
    %180 = math.tanh %179 : vector<2x64xf32>
    %cst_31 = arith.constant 1.000000e+00 : f32
    %181 = vector.broadcast %cst_31 : f32 to vector<2x64xf32>
    %182 = arith.subf %181, %174 : vector<2x64xf32>
    %183 = arith.mulf %182, %180 : vector<2x64xf32>
    %184 = arith.mulf %174, %155 : vector<2x64xf32>
    %185 = arith.addf %183, %184 : vector<2x64xf32>
    %186 = vector.extract_strided_slice %185 {offsets = [0, 0], sizes = [2, 32], strides = [1, 1]} : vector<2x64xf32> to vector<2x32xf32>
    %187 = vector.extract_strided_slice %185 {offsets = [0, 32], sizes = [2, 32], strides = [1, 1]} : vector<2x64xf32> to vector<2x32xf32>
    %188 = arith.maximumf %156, %186 : vector<2x32xf32>
    %189 = arith.maximumf %157, %187 : vector<2x32xf32>
    %cst_32 = arith.constant dense<0.000000e+00> : vector<2x192xf32>
    %190 = tpu.matmul %185, %15, %cst_32 {dimension_numbers = #tpu.dot_dimension_numbers<[1], [0], [0], [1], [0, 0, 1, 1], [], []>} : vector<2x64xf32>, vector<64x192xf32>, vector<2x192xf32> -> vector<2x192xf32>
    %191 = vector.extract_strided_slice %53 {offsets = [0, 0], sizes = [2, 64], strides = [1, 1]} : vector<2x192xf32> to vector<2x64xf32>
    %192 = vector.extract_strided_slice %190 {offsets = [0, 0], sizes = [2, 64], strides = [1, 1]} : vector<2x192xf32> to vector<2x64xf32>
    %193 = arith.addf %191, %192 : vector<2x64xf32>
    %194 = arith.negf %193 : vector<2x64xf32>
    %195 = math.exp %194 : vector<2x64xf32>
    %cst_33 = arith.constant 1.000000e+00 : f32
    %196 = vector.broadcast %cst_33 : f32 to vector<2x64xf32>
    %197 = arith.addf %196, %195 : vector<2x64xf32>
    %198 = arith.divf %196, %197 : vector<2x64xf32>
    %199 = vector.extract_strided_slice %53 {offsets = [0, 64], sizes = [2, 64], strides = [1, 1]} : vector<2x192xf32> to vector<2x64xf32>
    %200 = vector.extract_strided_slice %190 {offsets = [0, 64], sizes = [2, 64], strides = [1, 1]} : vector<2x192xf32> to vector<2x64xf32>
    %201 = arith.addf %199, %200 : vector<2x64xf32>
    %202 = arith.negf %201 : vector<2x64xf32>
    %203 = math.exp %202 : vector<2x64xf32>
    %cst_34 = arith.constant 1.000000e+00 : f32
    %204 = vector.broadcast %cst_34 : f32 to vector<2x64xf32>
    %205 = arith.addf %204, %203 : vector<2x64xf32>
    %206 = arith.divf %204, %205 : vector<2x64xf32>
    %207 = vector.extract_strided_slice %53 {offsets = [0, 128], sizes = [2, 64], strides = [1, 1]} : vector<2x192xf32> to vector<2x64xf32>
    %208 = vector.extract_strided_slice %190 {offsets = [0, 128], sizes = [2, 64], strides = [1, 1]} : vector<2x192xf32> to vector<2x64xf32>
    %209 = arith.addf %208, %18 : vector<2x64xf32>
    %210 = arith.mulf %198, %209 : vector<2x64xf32>
    %211 = arith.addf %207, %210 : vector<2x64xf32>
    %212 = math.tanh %211 : vector<2x64xf32>
    %cst_35 = arith.constant 1.000000e+00 : f32
    %213 = vector.broadcast %cst_35 : f32 to vector<2x64xf32>
    %214 = arith.subf %213, %206 : vector<2x64xf32>
    %215 = arith.mulf %214, %212 : vector<2x64xf32>
    %216 = arith.mulf %206, %185 : vector<2x64xf32>
    %217 = arith.addf %215, %216 : vector<2x64xf32>
    %218 = vector.extract_strided_slice %217 {offsets = [0, 0], sizes = [2, 32], strides = [1, 1]} : vector<2x64xf32> to vector<2x32xf32>
    %219 = vector.extract_strided_slice %217 {offsets = [0, 32], sizes = [2, 32], strides = [1, 1]} : vector<2x64xf32> to vector<2x32xf32>
    %cst_36 = arith.constant dense<0.000000e+00> : vector<2x192xf32>
    %220 = tpu.matmul %217, %15, %cst_36 {dimension_numbers = #tpu.dot_dimension_numbers<[1], [0], [0], [1], [0, 0, 1, 1], [], []>} : vector<2x64xf32>, vector<64x192xf32>, vector<2x192xf32> -> vector<2x192xf32>
    %221 = vector.extract_strided_slice %60 {offsets = [0, 0], sizes = [2, 64], strides = [1, 1]} : vector<2x192xf32> to vector<2x64xf32>
    %222 = vector.extract_strided_slice %220 {offsets = [0, 0], sizes = [2, 64], strides = [1, 1]} : vector<2x192xf32> to vector<2x64xf32>
    %223 = arith.addf %221, %222 : vector<2x64xf32>
    %224 = arith.negf %223 : vector<2x64xf32>
    %225 = math.exp %224 : vector<2x64xf32>
    %cst_37 = arith.constant 1.000000e+00 : f32
    %226 = vector.broadcast %cst_37 : f32 to vector<2x64xf32>
    %227 = arith.addf %226, %225 : vector<2x64xf32>
    %228 = arith.divf %226, %227 : vector<2x64xf32>
    %229 = vector.extract_strided_slice %60 {offsets = [0, 64], sizes = [2, 64], strides = [1, 1]} : vector<2x192xf32> to vector<2x64xf32>
    %230 = vector.extract_strided_slice %220 {offsets = [0, 64], sizes = [2, 64], strides = [1, 1]} : vector<2x192xf32> to vector<2x64xf32>
    %231 = arith.addf %229, %230 : vector<2x64xf32>
    %232 = arith.negf %231 : vector<2x64xf32>
    %233 = math.exp %232 : vector<2x64xf32>
    %cst_38 = arith.constant 1.000000e+00 : f32
    %234 = vector.broadcast %cst_38 : f32 to vector<2x64xf32>
    %235 = arith.addf %234, %233 : vector<2x64xf32>
    %236 = arith.divf %234, %235 : vector<2x64xf32>
    %237 = vector.extract_strided_slice %60 {offsets = [0, 128], sizes = [2, 64], strides = [1, 1]} : vector<2x192xf32> to vector<2x64xf32>
    %238 = vector.extract_strided_slice %220 {offsets = [0, 128], sizes = [2, 64], strides = [1, 1]} : vector<2x192xf32> to vector<2x64xf32>
    %239 = arith.addf %238, %18 : vector<2x64xf32>
    %240 = arith.mulf %228, %239 : vector<2x64xf32>
    %241 = arith.addf %237, %240 : vector<2x64xf32>
    %242 = math.tanh %241 : vector<2x64xf32>
    %cst_39 = arith.constant 1.000000e+00 : f32
    %243 = vector.broadcast %cst_39 : f32 to vector<2x64xf32>
    %244 = arith.subf %243, %236 : vector<2x64xf32>
    %245 = arith.mulf %244, %242 : vector<2x64xf32>
    %246 = arith.mulf %236, %217 : vector<2x64xf32>
    %247 = arith.addf %245, %246 : vector<2x64xf32>
    %248 = vector.extract_strided_slice %247 {offsets = [0, 0], sizes = [2, 32], strides = [1, 1]} : vector<2x64xf32> to vector<2x32xf32>
    %249 = vector.extract_strided_slice %247 {offsets = [0, 32], sizes = [2, 32], strides = [1, 1]} : vector<2x64xf32> to vector<2x32xf32>
    %250 = arith.maximumf %218, %248 : vector<2x32xf32>
    %251 = arith.maximumf %219, %249 : vector<2x32xf32>
    %cst_40 = arith.constant dense<0.000000e+00> : vector<2x192xf32>
    %252 = tpu.matmul %247, %15, %cst_40 {dimension_numbers = #tpu.dot_dimension_numbers<[1], [0], [0], [1], [0, 0, 1, 1], [], []>} : vector<2x64xf32>, vector<64x192xf32>, vector<2x192xf32> -> vector<2x192xf32>
    %253 = vector.extract_strided_slice %67 {offsets = [0, 0], sizes = [2, 64], strides = [1, 1]} : vector<2x192xf32> to vector<2x64xf32>
    %254 = vector.extract_strided_slice %252 {offsets = [0, 0], sizes = [2, 64], strides = [1, 1]} : vector<2x192xf32> to vector<2x64xf32>
    %255 = arith.addf %253, %254 : vector<2x64xf32>
    %256 = arith.negf %255 : vector<2x64xf32>
    %257 = math.exp %256 : vector<2x64xf32>
    %cst_41 = arith.constant 1.000000e+00 : f32
    %258 = vector.broadcast %cst_41 : f32 to vector<2x64xf32>
    %259 = arith.addf %258, %257 : vector<2x64xf32>
    %260 = arith.divf %258, %259 : vector<2x64xf32>
    %261 = vector.extract_strided_slice %67 {offsets = [0, 64], sizes = [2, 64], strides = [1, 1]} : vector<2x192xf32> to vector<2x64xf32>
    %262 = vector.extract_strided_slice %252 {offsets = [0, 64], sizes = [2, 64], strides = [1, 1]} : vector<2x192xf32> to vector<2x64xf32>
    %263 = arith.addf %261, %262 : vector<2x64xf32>
    %264 = arith.negf %263 : vector<2x64xf32>
    %265 = math.exp %264 : vector<2x64xf32>
    %cst_42 = arith.constant 1.000000e+00 : f32
    %266 = vector.broadcast %cst_42 : f32 to vector<2x64xf32>
    %267 = arith.addf %266, %265 : vector<2x64xf32>
    %268 = arith.divf %266, %267 : vector<2x64xf32>
    %269 = vector.extract_strided_slice %67 {offsets = [0, 128], sizes = [2, 64], strides = [1, 1]} : vector<2x192xf32> to vector<2x64xf32>
    %270 = vector.extract_strided_slice %252 {offsets = [0, 128], sizes = [2, 64], strides = [1, 1]} : vector<2x192xf32> to vector<2x64xf32>
    %271 = arith.addf %270, %18 : vector<2x64xf32>
    %272 = arith.mulf %260, %271 : vector<2x64xf32>
    %273 = arith.addf %269, %272 : vector<2x64xf32>
    %274 = math.tanh %273 : vector<2x64xf32>
    %cst_43 = arith.constant 1.000000e+00 : f32
    %275 = vector.broadcast %cst_43 : f32 to vector<2x64xf32>
    %276 = arith.subf %275, %268 : vector<2x64xf32>
    %277 = arith.mulf %276, %274 : vector<2x64xf32>
    %278 = arith.mulf %268, %247 : vector<2x64xf32>
    %279 = arith.addf %277, %278 : vector<2x64xf32>
    %280 = vector.extract_strided_slice %279 {offsets = [0, 0], sizes = [2, 32], strides = [1, 1]} : vector<2x64xf32> to vector<2x32xf32>
    %281 = vector.extract_strided_slice %279 {offsets = [0, 32], sizes = [2, 32], strides = [1, 1]} : vector<2x64xf32> to vector<2x32xf32>
    %cst_44 = arith.constant dense<0.000000e+00> : vector<2x192xf32>
    %282 = tpu.matmul %279, %15, %cst_44 {dimension_numbers = #tpu.dot_dimension_numbers<[1], [0], [0], [1], [0, 0, 1, 1], [], []>} : vector<2x64xf32>, vector<64x192xf32>, vector<2x192xf32> -> vector<2x192xf32>
    %283 = vector.extract_strided_slice %74 {offsets = [0, 0], sizes = [2, 64], strides = [1, 1]} : vector<2x192xf32> to vector<2x64xf32>
    %284 = vector.extract_strided_slice %282 {offsets = [0, 0], sizes = [2, 64], strides = [1, 1]} : vector<2x192xf32> to vector<2x64xf32>
    %285 = arith.addf %283, %284 : vector<2x64xf32>
    %286 = arith.negf %285 : vector<2x64xf32>
    %287 = math.exp %286 : vector<2x64xf32>
    %cst_45 = arith.constant 1.000000e+00 : f32
    %288 = vector.broadcast %cst_45 : f32 to vector<2x64xf32>
    %289 = arith.addf %288, %287 : vector<2x64xf32>
    %290 = arith.divf %288, %289 : vector<2x64xf32>
    %291 = vector.extract_strided_slice %74 {offsets = [0, 64], sizes = [2, 64], strides = [1, 1]} : vector<2x192xf32> to vector<2x64xf32>
    %292 = vector.extract_strided_slice %282 {offsets = [0, 64], sizes = [2, 64], strides = [1, 1]} : vector<2x192xf32> to vector<2x64xf32>
    %293 = arith.addf %291, %292 : vector<2x64xf32>
    %294 = arith.negf %293 : vector<2x64xf32>
    %295 = math.exp %294 : vector<2x64xf32>
    %cst_46 = arith.constant 1.000000e+00 : f32
    %296 = vector.broadcast %cst_46 : f32 to vector<2x64xf32>
    %297 = arith.addf %296, %295 : vector<2x64xf32>
    %298 = arith.divf %296, %297 : vector<2x64xf32>
    %299 = vector.extract_strided_slice %74 {offsets = [0, 128], sizes = [2, 64], strides = [1, 1]} : vector<2x192xf32> to vector<2x64xf32>
    %300 = vector.extract_strided_slice %282 {offsets = [0, 128], sizes = [2, 64], strides = [1, 1]} : vector<2x192xf32> to vector<2x64xf32>
    %301 = arith.addf %300, %18 : vector<2x64xf32>
    %302 = arith.mulf %290, %301 : vector<2x64xf32>
    %303 = arith.addf %299, %302 : vector<2x64xf32>
    %304 = math.tanh %303 : vector<2x64xf32>
    %cst_47 = arith.constant 1.000000e+00 : f32
    %305 = vector.broadcast %cst_47 : f32 to vector<2x64xf32>
    %306 = arith.subf %305, %298 : vector<2x64xf32>
    %307 = arith.mulf %306, %304 : vector<2x64xf32>
    %308 = arith.mulf %298, %279 : vector<2x64xf32>
    %309 = arith.addf %307, %308 : vector<2x64xf32>
    %310 = vector.extract_strided_slice %309 {offsets = [0, 0], sizes = [2, 32], strides = [1, 1]} : vector<2x64xf32> to vector<2x32xf32>
    %311 = vector.extract_strided_slice %309 {offsets = [0, 32], sizes = [2, 32], strides = [1, 1]} : vector<2x64xf32> to vector<2x32xf32>
    %312 = arith.maximumf %280, %310 : vector<2x32xf32>
    %313 = arith.maximumf %281, %311 : vector<2x32xf32>
    %314 = vector.extract_strided_slice %126 {offsets = [0, 0], sizes = [1, 32], strides = [1, 1]} : vector<2x32xf32> to vector<1x32xf32>
    %315 = vector.extract_strided_slice %313 {offsets = [0, 0], sizes = [1, 32], strides = [1, 1]} : vector<2x32xf32> to vector<1x32xf32>
    %316 = tpu.concatenate %314, %315 in 1 : vector<1x32xf32>, vector<1x32xf32> -> vector<1x64xf32>
    %317 = vector.extract_strided_slice %188 {offsets = [0, 0], sizes = [1, 32], strides = [1, 1]} : vector<2x32xf32> to vector<1x32xf32>
    %318 = vector.extract_strided_slice %251 {offsets = [0, 0], sizes = [1, 32], strides = [1, 1]} : vector<2x32xf32> to vector<1x32xf32>
    %319 = tpu.concatenate %317, %318 in 1 : vector<1x32xf32>, vector<1x32xf32> -> vector<1x64xf32>
    %320 = vector.extract_strided_slice %250 {offsets = [0, 0], sizes = [1, 32], strides = [1, 1]} : vector<2x32xf32> to vector<1x32xf32>
    %321 = vector.extract_strided_slice %189 {offsets = [0, 0], sizes = [1, 32], strides = [1, 1]} : vector<2x32xf32> to vector<1x32xf32>
    %322 = tpu.concatenate %320, %321 in 1 : vector<1x32xf32>, vector<1x32xf32> -> vector<1x64xf32>
    %323 = vector.extract_strided_slice %312 {offsets = [0, 0], sizes = [1, 32], strides = [1, 1]} : vector<2x32xf32> to vector<1x32xf32>
    %324 = vector.extract_strided_slice %127 {offsets = [0, 0], sizes = [1, 32], strides = [1, 1]} : vector<2x32xf32> to vector<1x32xf32>
    %325 = tpu.concatenate %323, %324 in 1 : vector<1x32xf32>, vector<1x32xf32> -> vector<1x64xf32>
    %326 = vector.extract_strided_slice %126 {offsets = [1, 0], sizes = [1, 32], strides = [1, 1]} : vector<2x32xf32> to vector<1x32xf32>
    %327 = vector.extract_strided_slice %313 {offsets = [1, 0], sizes = [1, 32], strides = [1, 1]} : vector<2x32xf32> to vector<1x32xf32>
    %328 = tpu.concatenate %326, %327 in 1 : vector<1x32xf32>, vector<1x32xf32> -> vector<1x64xf32>
    %329 = vector.extract_strided_slice %188 {offsets = [1, 0], sizes = [1, 32], strides = [1, 1]} : vector<2x32xf32> to vector<1x32xf32>
    %330 = vector.extract_strided_slice %251 {offsets = [1, 0], sizes = [1, 32], strides = [1, 1]} : vector<2x32xf32> to vector<1x32xf32>
    %331 = tpu.concatenate %329, %330 in 1 : vector<1x32xf32>, vector<1x32xf32> -> vector<1x64xf32>
    %332 = vector.extract_strided_slice %250 {offsets = [1, 0], sizes = [1, 32], strides = [1, 1]} : vector<2x32xf32> to vector<1x32xf32>
    %333 = vector.extract_strided_slice %189 {offsets = [1, 0], sizes = [1, 32], strides = [1, 1]} : vector<2x32xf32> to vector<1x32xf32>
    %334 = tpu.concatenate %332, %333 in 1 : vector<1x32xf32>, vector<1x32xf32> -> vector<1x64xf32>
    %335 = vector.extract_strided_slice %312 {offsets = [1, 0], sizes = [1, 32], strides = [1, 1]} : vector<2x32xf32> to vector<1x32xf32>
    %336 = vector.extract_strided_slice %127 {offsets = [1, 0], sizes = [1, 32], strides = [1, 1]} : vector<2x32xf32> to vector<1x32xf32>
    %337 = tpu.concatenate %335, %336 in 1 : vector<1x32xf32>, vector<1x32xf32> -> vector<1x64xf32>
    %338 = tpu.concatenate %316, %319, %322, %325, %328, %331, %334, %337 in 0 : vector<1x64xf32>, vector<1x64xf32>, vector<1x64xf32>, vector<1x64xf32>, vector<1x64xf32>, vector<1x64xf32>, vector<1x64xf32>, vector<1x64xf32> -> vector<8x64xf32>
    %c0_48 = arith.constant 0 : index
    %c0_49 = arith.constant 0 : index
    %339 = vector.load %arg5[%c0_48, %c0_49] : memref<64x32xf32, #tpu.memory_space<vmem>>, vector<64x32xf32>
    %cst_50 = arith.constant dense<0.000000e+00> : vector<8x32xf32>
    %340 = tpu.matmul %338, %339, %cst_50 {dimension_numbers = #tpu.dot_dimension_numbers<[1], [0], [0], [1], [0, 0, 1, 1], [], []>} : vector<8x64xf32>, vector<64x32xf32>, vector<8x32xf32> -> vector<8x32xf32>
    %c0_51 = arith.constant 0 : index
    %c0_52 = arith.constant 0 : index
    %341 = vector.load %arg6[%c0_51, %c0_52] : memref<1x32xf32, #tpu.memory_space<vmem>>, vector<1x32xf32>
    %342 = vector.broadcast %341 : vector<1x32xf32> to vector<8x32xf32>
    %343 = arith.addf %340, %342 : vector<8x32xf32>
    %cst_53 = arith.constant 0.000000e+00 : f32
    %344 = vector.broadcast %cst_53 : f32 to vector<8x32xf32>
    %345 = arith.maximumf %343, %344 : vector<8x32xf32>
    %c0_54 = arith.constant 0 : index
    %c0_55 = arith.constant 0 : index
    %346 = vector.load %arg7[%c0_54, %c0_55] : memref<32x6xf32, #tpu.memory_space<vmem>>, vector<32x6xf32>
    %cst_56 = arith.constant dense<0.000000e+00> : vector<8x6xf32>
    %347 = tpu.matmul %345, %346, %cst_56 {dimension_numbers = #tpu.dot_dimension_numbers<[1], [0], [0], [1], [0, 0, 1, 1], [], []>} : vector<8x32xf32>, vector<32x6xf32>, vector<8x6xf32> -> vector<8x6xf32>
    %c0_57 = arith.constant 0 : index
    %c0_58 = arith.constant 0 : index
    %348 = vector.load %arg8[%c0_57, %c0_58] : memref<1x6xf32, #tpu.memory_space<vmem>>, vector<1x6xf32>
    %349 = vector.broadcast %348 : vector<1x6xf32> to vector<8x6xf32>
    %350 = arith.addf %347, %349 : vector<8x6xf32>
    %351 = arith.negf %350 : vector<8x6xf32>
    %352 = math.exp %351 : vector<8x6xf32>
    %cst_59 = arith.constant 1.000000e+00 : f32
    %353 = vector.broadcast %cst_59 : f32 to vector<8x6xf32>
    %354 = arith.addf %353, %352 : vector<8x6xf32>
    %355 = arith.divf %353, %354 : vector<8x6xf32>
    %c0_60 = arith.constant 0 : index
    %c0_61 = arith.constant 0 : index
    %356 = vector.load %arg9[%c0_60, %c0_61] : memref<8x6xf32, #tpu.memory_space<vmem>>, vector<8x6xf32>
    tpu.vector_store %arg9[%c0_60, %c0_61], %355 {strides = array<i32>} : memref<8x6xf32, #tpu.memory_space<vmem>>, vector<8x6xf32>,
    return
  }
}

</mosaic_0001>

<bundles_post_ra>
// kernel: grunet_forward.1
= control target key start
LH: loop header
LB: loop body
LE: loop exit
PB: predicated region body
PF: predicated region fallthrough
CT: control target
= control target key end

     0   :  { %14 = vsyncpa [#allocation3], 0  ;;  %s2182_s0 = inlined_call_operand.vmem [shape: f32[16,16], index: 0, kind: input, shape index: {}]   ;;  %s2183_s1 = inlined_call_operand.hbm [shape: f32[2,16,192], index: 1, kind: input, shape index: {}]   ;;  %s2184_s2 = inlined_call_operand.vmem [shape: f32[2,1,192], index: 2, kind: input, shape index: {}]   ;;  %s2185_s3 = inlined_call_operand.vmem [shape: f32[64,192], index: 3, kind: input, shape index: {}]   ;;  %s2186_s4 = inlined_call_operand.vmem [shape: f32[1,64], index: 4, kind: input, shape index: {}]   ;;  %s2187_s5 = inlined_call_operand.vmem [shape: f32[64,32], index: 5, kind: input, shape index: {}]   ;;  %s2188_s6 = inlined_call_operand.vmem [shape: f32[1,32], index: 6, kind: input, shape index: {}]   ;;  %s2189_s7 = inlined_call_operand.vmem [shape: f32[32,6], index: 7, kind: input, shape index: {}]   ;;  %s2190_s8 = inlined_call_operand.vmem [shape: f32[1,6], index: 8, kind: input, shape index: {}]   ;;  %s2191_s9 = inlined_call_operand.hbm [shape: f32[8,6], index: 9, kind: output, shape index: {}]  }
   0x1   :  { %15 = vsyncpa [#allocation4], 0  ;;  %s1685_s30 = smov [#allocation2]   ;;  %s1637_s13 = scalar_lea.hbm %s2183_s1, 1024 }
   0x2   :  { %s23_s10 = sshll.u32 %s1685_s30, 4  ;;  %p1638_p0 = scmp.ne.s32.totalorder %s2183_s1, %s1637_s13  ;;  %s24_s10 = int_to_ptr.vmem [resolvable:$true] %s23_s10 }
   0x3   :  { %p1641_p1 = scmp.lt.u32.totalorder %s1637_s13, %s2183_s1 }
   0x5   :  { %p1643_p2 = pnand %p1641_p1, %p1638_p0 }
   0x7   :  { %1646 = shalt.err (!%p1643_p2)
}
   0x8   :  { %s1647_s18 = scalar_lea.vmem %s24_s10, 1024  ;;  %p1652_p4 = scmp.lt.s32.totalorder %s24_s10, %s24_s10 }
   0x9   :  { %p1648_p3 = scmp.ne.s32.totalorder %s24_s10, %s1647_s18  ;;  %p1653_p5 = scmp.lt.s32.totalorder %s1647_s18, %s1647_s18 }
   0xb   :  { %p1654_p6 = por %p1653_p5, %p1652_p4 }
   0xd   :  { %p1655_p7 = pnand %p1654_p6, %p1648_p3 }
   0xf   :  { %1658 = shalt.err (!%p1655_p7)
}
  0x10   :  { %s1686_s19 = smov 256   ;;  %s1687_s20 = smov 16  }
  0x11   :  { %29 = dma.hbm_to_vmem [thread:$0]  %s2183_s1, 1024, %s24_s10, [#allocation3], %s1686_s19, %s1686_s19, %s1687_s20  }
  0x12   :  { %1681 = dma.done.wait [#allocation3], 1024  }
  0x13   :  { %1682 = vsyncadd [#allocation3], 4294966272  ;;  %v1688_v0 = vmov 0.0   ;;  %v50_v1 = vld [vmem:[#allocation2 + $0x8] sm:$0xff]  ;;  %v52_v2 = vld [vmem:[#allocation2 + $0x18] sm:$0xff]  ;;  %vm65_vm0 = vcmask 130048   ;;  %v55_v15 = vlaneseq }
  0x14   :  { %136 = vmatprep.mubr.f32.mxu0 %v1688_v0  ;;  %231 = vmatprep.mubr.f32.mxu1 %v1688_v0  ;;  %v151_v3 = vld [vmem:[#allocation2 + $0x28] sm:$0xff]  ;;  %v1439_v4 = vpack.c.bf16 %v52_v2, %v50_v1  ;;  %v153_v5 = vld [vmem:[#allocation2 + $0x38] sm:$0xff]  ;;  %v49_v6 = vld [vmem:[#allocation2] sm:$0xff]  ;;  %vm273_vm1 = vcmask 1040384   ;;  %s1689_s15 = smov 64   ;;  %vm454_vm2 = vcmask 523264  }
  0x15   :  { %v51_v7 = vld [vmem:[#allocation2 + $0x10] sm:$0xff]  ;;  %v1443_v8 = vpack.c.bf16 %v153_v5, %v151_v3  ;;  %v150_v10 = vld [vmem:[#allocation2 + $0x20] sm:$0xff]  ;;  %v48_v14 = vld [vmem:[%s2182_s0 + $0x8] sm:$0xff]  ;;  %v56_v16 = vshrl.u32 %v55_v15, 7  ;;  %vm1691_vm3 = vmmov 0   ;;  %vm1129_vm4 = vcmask 261120  }
  0x16   :  { %v1441_v9 = vpack.c.bf16 %v51_v7, %v49_v6  ;;  %v152_v11 = vld [vmem:[#allocation2 + $0x30] sm:$0xff]  ;;  %1440 = vmatprep.subr.bf16.mxu0 %v1439_v4  ;;  %v47_v13 = vld [vmem:[%s2182_s0] sm:$0xff]  ;;  %vm1161_vm5 = vcmask 1041408   ;;  %vm1163_vm6 = vcmask 1042432   ;;  %vm1165_vm7 = vcmask 1043456  }
  0x17   :  { %v1445_v12 = vpack.c.bf16 %v152_v11, %v150_v10  ;;  %1444 = vmatprep.subr.bf16.mxu1 %v1443_v8  ;;  %v57_v17 = vsub.s32 0, %v56_v16  ;;  %v53_v18 = vld [vmem:[%s2184_s2] sm:$0x3]  ;;  %v61_v19 = vsub.s32 1, %v56_v16  ;;  %v1371_v20 = vld [vmem:[%s2184_s2 + $0x2] sm:$0x3] }
  0x18   :  { %1442 = vmatpush1.bf16.msra.mxu0 %v1441_v9  ;;  %vm1167_vm8 = vcmask 1044480   ;;  %vm1169_vm9 = vcmask 1045504   ;;  %vm1171_vm10 = vcmask 1046528   ;;  %vm1352_vm11 = vcmask 48128  }
  0x19   :  { %1446 = vmatpush1.bf16.msra.mxu1 %v1445_v12  ;;  %v58_v21 = vrot.slane %v53_v18, %v57_v17  ;;  %v160_v22 = vrot.slane %v1371_v20, %v57_v17  ;;  %v62_v23 = vrot.slane %v53_v18, %v61_v19  ;;  %v164_v24 = vrot.slane %v1371_v20, %v61_v19 }
  0x1b   :  { %1369 = vmatmul.mubr.msk.f32.vlgmr.msra.gmra.mrb[0].mxu0 %vm65_vm0, %v47_v13 }
  0x1c   :  { %1372 = vmatmul.mubr.msk.f32.vlgmr.msra.gmra.mrb[0].mxu1 %vm65_vm0, %v47_v13  ;;  %142 = vmatprep.mubr.f32.mxu0 %v1688_v0 }
  0x1d   :  { %237 = vmatprep.mubr.f32.mxu1 %v1688_v0 }
  0x1f   :  { %1370 = vmatmul.mubr.msk.f32.gmra.mrb[2].mxu0 %vm65_vm0, %v48_v14 }
  0x20   :  { %1373 = vmatmul.mubr.msk.f32.gmra.mrb[2].mxu1 %vm65_vm0, %v48_v14  ;;  %521 = vmatprep.mubr.f32.mxu0 %v1688_v0 }
  0x21   :  { %617 = vmatprep.mubr.f32.mxu1 %v1688_v0 }
  0xee   :  { %v138_v25 = vpop.f32.mrb[0].mxu0 }
  0xef   :  { %v1773_v26 = vadd.f32 %v138_v25, %v58_v21  ;;  %v233_v27 = vpop.f32.mrb[0].mxu1  ;;  %v140_v28 = vpop.f32.mrb[1].mxu0 }
  0xf0   :  { %v1775_v29 = vadd.f32 %v233_v27, %v160_v22  ;;  %v1777_v30 = vadd.f32 %v140_v28, %v62_v23  ;;  %v235_v31 = vpop.f32.mrb[1].mxu1 }
  0xf1   :  { %v1779_v32 = vadd.f32 %v235_v31, %v164_v24  ;;  %v294_v33 = vrot.slane %v1773_v26, 1  ;;  %v312_v34 = vrot.slane %v1773_v26, 2  ;;  %v334_v35 = vrot.slane %v1773_v26, 3 }
  0xf2   :  { %v278_v36 = vrot.slane %v1775_v29, 7  ;;  %v144_v37 = vpop.f32.mrb[2].mxu0  ;;  %v300_v38 = vrot.slane %v1775_v29, 6  ;;  %v295_v39 = vrot.slane %v1777_v30, 1  ;;  %v322_v40 = vrot.slane %v1775_v29, 5 }
  0xf3   :  { %v1788_v41 = vadd.f32 %v144_v37, %v58_v21  ;;  %v239_v42 = vpop.f32.mrb[2].mxu1  ;;  %v146_v43 = vpop.f32.mrb[3].mxu0  ;;  %v279_v44 = vrot.slane %v1779_v32, 7  ;;  %v301_v45 = vrot.slane %v1779_v32, 6  ;;  %v313_v46 = vrot.slane %v1777_v30, 2 }
  0xf4   :  { %v1793_v47 = vadd.f32 %v239_v42, %v160_v22  ;;  %v1795_v48 = vadd.f32 %v146_v43, %v62_v23  ;;  %v241_v49 = vpop.f32.mrb[3].mxu1  ;;  %v323_v50 = vrot.slane %v1779_v32, 5  ;;  %v344_v51 = vrot.slane %v1775_v29, 4 }
  0xf5   :  { %v269_v52 = vrot.slane %v1788_v41, 7  ;;  %v1800_v53 = vadd.f32 %v241_v49, %v164_v24  ;;  %v298_v54 = vsel %vm273_vm1, %v294_v33, %v1788_v41  ;;  %v316_v55 = vrot.slane %v1788_v41, 1 }
  0xf6   :  { %v284_v56 = vrot.slane %v1793_v47, 6  ;;  %v270_v57 = vrot.slane %v1795_v48, 7  ;;  %v304_v58 = vrot.slane %v1793_v47, 5  ;;  %v299_v59 = vsel %vm273_vm1, %v295_v39, %v1795_v48 }
  0xf7   :  { %v274_v60 = vsel %vm273_vm1, %v1773_v26, %v269_v52  ;;  %v285_v61 = vrot.slane %v1800_v53, 6  ;;  %v305_v62 = vrot.slane %v1800_v53, 5  ;;  %v320_v63 = vsel %vm273_vm1, %v312_v34, %v316_v55 }
  0xf8   :  { %v275_v1 = vsel %vm273_vm1, %v1777_v30, %v270_v57  ;;  %v288_v2 = vsel %vm273_vm1, %v278_v36, %v284_v56  ;;  %v308_v3 = vsel %vm273_vm1, %v300_v38, %v304_v58  ;;  %v326_v4 = vrot.slane %v1793_v47, 4 }
  0xf9   :  { %v289_v5 = vsel %vm273_vm1, %v279_v44, %v285_v61  ;;  %v290_v6 = vadd.f32 %v288_v2, %v274_v60  ;;  %v1821_v7 = vadd.f32 %v308_v3, %v298_v54  ;;  %v309_v8 = vsel %vm273_vm1, %v301_v45, %v305_v62 }
  0xfa   :  { %v1824_v9 = vadd.f32 %v289_v5, %v275_v1  ;;  %v1826_v10 = vadd.f32 %v309_v8, %v299_v59  ;;  %v330_v11 = vsel %vm273_vm1, %v322_v40, %v326_v4  ;;  %v317_v12 = vrot.slane %v1795_v48, 1 }
  0xfb   :  { %v1375_v13 = vmul.f32 -1.442695, %v290_v6  ;;  %v1830_v14 = vadd.f32 %v330_v11, %v320_v63  ;;  %v327_v15 = vrot.slane %v1800_v53, 4  ;;  %v338_v16 = vrot.slane %v1788_v41, 2 }
  0xfc   :  { %v321_v17 = vsel %vm273_vm1, %v313_v46, %v317_v12  ;;  %v348_v18 = vrot.slane %v1793_v47, 3  ;;  %v335_v19 = vrot.slane %v1777_v30, 3  ;;  %v339_v20 = vrot.slane %v1795_v48, 2 }
  0xfd   :  { %1585 = vpow2.f32 %v1375_v13  ;;  %v331_v21 = vsel %vm273_vm1, %v323_v50, %v327_v15  ;;  %v342_v22 = vsel %vm273_vm1, %v334_v35, %v338_v16  ;;  %v345_v23 = vrot.slane %v1779_v32, 4 }
  0xfe   :  { %v1841_v24 = vadd.f32 %v331_v21, %v321_v17  ;;  %v352_v25 = vsel %vm273_vm1, %v344_v51, %v348_v18  ;;  %v343_v27 = vsel %vm273_vm1, %v335_v19, %v339_v20  ;;  %v349_v28 = vrot.slane %v1800_v53, 3 }
  0xff   :  { %v1846_v31 = vadd.f32 %v352_v25, %v342_v22  ;;  %v356_v33 = vrot.slane %v1773_v26, 4  ;;  %v360_v34 = vrot.slane %v1788_v41, 3  ;;  %v366_v36 = vrot.slane %v1775_v29, 3 }
 0x100   :  { %v353_v35 = vsel %vm273_vm1, %v345_v23, %v349_v28  ;;  %v370_v37 = vrot.slane %v1793_v47, 2  ;;  %v357_v38 = vrot.slane %v1777_v30, 4  ;;  %v361_v39 = vrot.slane %v1795_v48, 3 }
 0x101   :  { %v1855_v40 = vadd.f32 %v353_v35, %v343_v27  ;;  %v364_v42 = vsel %vm273_vm1, %v356_v33, %v360_v34  ;;  %v367_v43 = vrot.slane %v1779_v32, 3  ;;  %v371_v44 = vrot.slane %v1800_v53, 2 }
 0x102   :  { %v374_v45 = vsel %vm273_vm1, %v366_v36, %v370_v37  ;;  %v365_v46 = vsel %vm273_vm1, %v357_v38, %v361_v39  ;;  %v378_v49 = vrot.slane %v1773_v26, 5  ;;  %v382_v50 = vrot.slane %v1788_v41, 4  ;;  %v244_v38 = vld [vmem:[%s2185_s3] sm:$0xff] }
 0x103   :  { %v1864_v51 = vadd.f32 %v374_v45, %v364_v42  ;;  %v375_v52 = vsel %vm273_vm1, %v367_v43, %v371_v44  ;;  %v388_v54 = vrot.slane %v1775_v29, 2  ;;  %v392_v55 = vrot.slane %v1793_v47, 1  ;;  %v246_v42 = vld [vmem:[%s2185_s3 + $0x10] sm:$0xff]  ;;  %v251_v43 = vld [vmem:[%s2185_s3 + $0x38] sm:$0xff] }
 0x104   :  { %v1869_v56 = vadd.f32 %v375_v52, %v365_v46  ;;  %v386_v57 = vsel %vm273_vm1, %v378_v49, %v382_v50  ;;  %v379_v58 = vrot.slane %v1777_v30, 5  ;;  %v383_v59 = vrot.slane %v1795_v48, 4  ;;  %v248_v46 = vld [vmem:[%s2185_s3 + $0x20] sm:$0xff]  ;;  %v250_v49 = vld [vmem:[%s2185_s3 + $0x30] sm:$0xff]  ;;  %v253_v50 = vld [vmem:[%s2185_s3 + $0x48] sm:$0xff] }
 0x105   :  { %v396_v60 = vsel %vm273_vm1, %v388_v54, %v392_v55  ;;  %v389_v61 = vrot.slane %v1779_v32, 2  ;;  %v393_v62 = vrot.slane %v1800_v53, 1  ;;  %v400_v63 = vrot.slane %v1773_v26, 6  ;;  %v255_v52 = vld [vmem:[%s2185_s3 + $0x58] sm:$0xff] }
 0x106   :  { %v1878_v1 = vadd.f32 %v396_v60, %v386_v57  ;;  %v387_v2 = vsel %vm273_vm1, %v379_v58, %v383_v59  ;;  %v404_v3 = vrot.slane %v1788_v41, 5  ;;  %v410_v4 = vrot.slane %v1775_v29, 1  ;;  %v252_v57 = vld [vmem:[%s2185_s3 + $0x40] sm:$0xff]  ;;  %v254_v58 = vld [vmem:[%s2185_s3 + $0x50] sm:$0xff]  ;;  %v257_v59 = vld [vmem:[%s2185_s3 + $0x68] sm:$0xff] }
 0x107   :  { %v1586_v5 = vpop.eup %1585  ;;  %v397_v6 = vsel %vm273_vm1, %v389_v61, %v393_v62  ;;  %v401_v8 = vrot.slane %v1777_v30, 6  ;;  %v405_v11 = vrot.slane %v1795_v48, 5  ;;  %v411_v12 = vrot.slane %v1779_v32, 1  ;;  %v259_v60 = vld [vmem:[%s2185_s3 + $0x78] sm:$0xff] }
 0x108   :  { %v439_v13 = vadd.f32 1.0, %v1586_v5  ;;  %v1887_v15 = vadd.f32 %v397_v6, %v387_v2  ;;  %v408_v16 = vsel %vm273_vm1, %v400_v63, %v404_v3  ;;  %v414_v17 = vsel %vm273_vm1, %v410_v4, %v1793_v47  ;;  %v256_v63 = vld [vmem:[%s2185_s3 + $0x60] sm:$0xff]  ;;  %v258_v2 = vld [vmem:[%s2185_s3 + $0x70] sm:$0xff] }
 0x109   :  { %v1892_v18 = vadd.f32 %v414_v17, %v408_v16  ;;  %v409_v19 = vsel %vm273_vm1, %v401_v8, %v405_v11  ;;  %v415_v20 = vsel %vm273_vm1, %v411_v12, %v1800_v53  ;;  %v418_v21 = vrot.slane %v1773_v26, 7 }
 0x10a   :  { %1587 = vrcp.f32 %v439_v13  ;;  %v1898_v22 = vadd.f32 %v415_v20, %v409_v19  ;;  %v422_v23 = vrot.slane %v1788_v41, 6  ;;  %v428_v25 = vrot.slane %v1793_v47, 7 }
 0x10b   :  { %v419_v27 = vrot.slane %v1777_v30, 7  ;;  %v423_v28 = vrot.slane %v1795_v48, 6  ;;  %v429_v33 = vrot.slane %v1800_v53, 7  ;;  %v1918_v30 = vld [vmem:[%s2186_s4] ss:$0 sm:$0xff]  ;;  %v1942_v44 = vpack.c.bf16 %v246_v42, %v244_v38 }
 0x10c   :  { %v426_v34 = vsel %vm273_vm1, %v418_v21, %v422_v23  ;;  %v432_v36 = vsel %vm273_vm1, %v1775_v29, %v428_v25  ;;  %v245_v29 = vld [vmem:[%s2185_s3 + $0x8] sm:$0xff]  ;;  %v1961_v54 = vpack.c.bf16 %v250_v49, %v248_v46  ;;  %v1965_v55 = vpack.c.bf16 %v255_v52, %v253_v50 }
 0x10d   :  { %v1908_v35 = vadd.f32 %v432_v36, %v426_v34  ;;  %v427_v26 = vsel %vm273_vm1, %v419_v27, %v423_v28  ;;  %v433_v41 = vsel %vm273_vm1, %v1779_v32, %v429_v33  ;;  %v247_v32 = vld [vmem:[%s2185_s3 + $0x18] sm:$0xff]  ;;  %v1981_v61 = vpack.c.bf16 %v254_v58, %v252_v57 }
 0x10e   :  { %v1913_v37 = vadd.f32 %v433_v41, %v427_v26  ;;  %v1931_v39 = vpack.c.bf16 %v247_v32, %v245_v29  ;;  %v1985_v62 = vpack.c.bf16 %v259_v60, %v257_v59  ;;  %v1996_v4 = vpack.c.bf16 %v258_v2, %v256_v63 }
 0x110   :  { %1448 = vmatprep.subr.bf16.mxu0 %v1931_v39  ;;  %1464 = vmatprep.subr.bf16.mxu1 %v1931_v39 }
 0x111   :  { %1450 = vmatpush1.bf16.msra.mxu0 %v1942_v44  ;;  %1466 = vmatpush1.bf16.msra.mxu1 %v1942_v44 }
 0x114   :  { %v1588_v47 = vpop.eup %1587 }
 0x115   :  { %v442_v48 = vmul.f32 %v1588_v47, %v1918_v30  ;;  %v445_v5 = vsub.f32 1.0, %v1588_v47 }
 0x117   :  { %v443_v53 = vadd.f32 %v442_v48, %v1824_v9  ;;  %v249_v9 = vld [vmem:[%s2185_s3 + $0x28] sm:$0xff] }
 0x118   :  { %v1944_v45 = vpack.c.bf16 %v251_v43, %v249_v9 }
 0x119   :  { %1589 = vtanh.f32 %v443_v53 }
 0x11a   :  { %1452 = vmatprep.subr.bf16.mxu0 %v1944_v45  ;;  %1468 = vmatprep.subr.bf16.mxu1 %v1944_v45 }
 0x11b   :  { %1454 = vmatpush1.bf16.msra.mxu0 %v1961_v54  ;;  %1470 = vmatpush1.bf16.msra.mxu1 %v1961_v54 }
 0x11c   :  { %1456 = vmatprep.subr.bf16.mxu0 %v1965_v55  ;;  %1472 = vmatprep.subr.bf16.mxu1 %v1965_v55 }
 0x11f   :  { %1458 = vmatpush1.bf16.msra.mxu0 %v1981_v61  ;;  %1474 = vmatpush1.bf16.msra.mxu1 %v1981_v61 }
 0x120   :  { %1460 = vmatprep.subr.bf16.mxu0 %v1985_v62  ;;  %1476 = vmatprep.subr.bf16.mxu1 %v1985_v62 }
 0x123   :  { %v1590_v3 = vpop.eup %1589  ;;  %1462 = vmatpush1.bf16.msra.mxu0 %v1996_v4  ;;  %1478 = vmatpush1.bf16.msra.mxu1 %v1996_v4 }
 0x124   :  { %447 = vrot.lane.b32.xlu0 %v1590_v3, %s1689_s15  ;;  %1480 = vmatprep.subr.bf16.mxu0 %v1931_v39 }
 0x125   :  { %1496 = vmatprep.subr.bf16.mxu1 %v1931_v39 }
 0x196   :  { %v448_v6 = vpop.permute.xlu0 %447 }
 0x197   :  { %v2005_v8 = vmul.f32 %v448_v6, %v445_v5 }
 0x199   :  { %452 = vrot.lane.b32.xlu0 %v2005_v8, %s1689_s15 }
 0x20b   :  { %v453_v11 = vpop.permute.xlu0 %452 }
 0x20c   :  { %1376 = vmatmul.mubr.msk.f32.vlgmr.msra.gmra.mrb[4].mxu0 %vm454_vm2, %v453_v11 }
 0x20d   :  { %1482 = vmatpush1.bf16.msra.mxu0 %v1942_v44  ;;  %712 = vmatprep.mubr.f32.mxu0 %v1688_v0 }
 0x20e   :  { %1484 = vmatprep.subr.bf16.mxu0 %v1944_v45 }
 0x211   :  { %1486 = vmatpush1.bf16.msra.mxu0 %v1961_v54 }
 0x212   :  { %1488 = vmatprep.subr.bf16.mxu0 %v1965_v55 }
 0x215   :  { %1490 = vmatpush1.bf16.msra.mxu0 %v1981_v61 }
 0x216   :  { %1492 = vmatprep.subr.bf16.mxu0 %v1985_v62 }
 0x219   :  { %1494 = vmatpush1.bf16.msra.mxu0 %v1996_v4 }
 0x21a   :  { %1512 = vmatprep.subr.bf16.mxu0 %v1931_v39 }
 0x2df   :  { %v523_v12 = vpop.f32.mrb[4].mxu0 }
 0x2e0   :  { %v528_v13 = vadd.f32 %v523_v12, %v1821_v7  ;;  %v525_v16 = vpop.f32.mrb[5].mxu0 }
 0x2e1   :  { %v535_v21 = vadd.f32 %v1918_v30, %v525_v16 }
 0x2e2   :  { %v1377_v17 = vmul.f32 -1.442695, %v528_v13 }
 0x2e4   :  { %1591 = vpow2.f32 %v1377_v17 }
 0x2ee   :  { %v1592_v19 = vpop.eup %1591 }
 0x2ef   :  { %v532_v20 = vadd.f32 1.0, %v1592_v19 }
 0x2f1   :  { %1593 = vrcp.f32 %v532_v20 }
 0x2fb   :  { %v1594_v23 = vpop.eup %1593 }
 0x2fc   :  { %v536_v25 = vmul.f32 %v1594_v23, %v535_v21  ;;  %v539_v33 = vsub.f32 1.0, %v1594_v23  ;;  %v545_v7 = vmul.f32 %v1594_v23, %v2005_v8 }
 0x2fe   :  { %v537_v27 = vadd.f32 %v536_v25, %v1826_v10 }
 0x300   :  { %1595 = vtanh.f32 %v537_v27 }
 0x30a   :  { %v1596_v28 = vpop.eup %1595 }
 0x30b   :  { %541 = vrot.lane.b32.xlu1 %v1596_v28, %s1689_s15 }
 0x37d   :  { %v542_v34 = vpop.permute.xlu1 %541 }
 0x37e   :  { %v544_v36 = vmul.f32 %v542_v34, %v539_v33 }
 0x380   :  { %v2024_v26 = vadd.f32 %v545_v7, %v544_v36 }
 0x382   :  { %549 = vrot.lane.b32.xlu1 %v2024_v26, %s1689_s15 }
 0x3f4   :  { %v550_v41 = vpop.permute.xlu1 %549 }
 0x3f5   :  { %1378 = vmatmul.mubr.msk.f32.vlgmr.msra.gmra.mrb[4].mxu1 %vm454_vm2, %v550_v41 }
 0x3f6   :  { %1498 = vmatpush1.bf16.msra.mxu1 %v1942_v44  ;;  %808 = vmatprep.mubr.f32.mxu1 %v1688_v0 }
 0x3f7   :  { %1500 = vmatprep.subr.bf16.mxu1 %v1944_v45 }
 0x3fa   :  { %1502 = vmatpush1.bf16.msra.mxu1 %v1961_v54 }
 0x3fb   :  { %1504 = vmatprep.subr.bf16.mxu1 %v1965_v55 }
 0x3fe   :  { %1506 = vmatpush1.bf16.msra.mxu1 %v1981_v61 }
 0x3ff   :  { %1508 = vmatprep.subr.bf16.mxu1 %v1985_v62 }
 0x402   :  { %1510 = vmatpush1.bf16.msra.mxu1 %v1996_v4 }
 0x403   :  { %1528 = vmatprep.subr.bf16.mxu1 %v1931_v39 }
 0x4c8   :  { %v619_v10 = vpop.f32.mrb[4].mxu1 }
 0x4c9   :  { %v624_v47 = vadd.f32 %v619_v10, %v1830_v14  ;;  %v621_v48 = vpop.f32.mrb[5].mxu1 }
 0x4ca   :  { %v631_v38 = vadd.f32 %v1918_v30, %v621_v48 }
 0x4cb   :  { %v1379_v53 = vmul.f32 -1.442695, %v624_v47 }
 0x4cd   :  { %1597 = vpow2.f32 %v1379_v53 }
 0x4d7   :  { %v1598_v29 = vpop.eup %1597 }
 0x4d8   :  { %v628_v32 = vadd.f32 1.0, %v1598_v29 }
 0x4da   :  { %1599 = vrcp.f32 %v628_v32 }
 0x4e4   :  { %v1600_v42 = vpop.eup %1599 }
 0x4e5   :  { %v632_v9 = vmul.f32 %v1600_v42, %v631_v38  ;;  %v635_v49 = vsub.f32 1.0, %v1600_v42  ;;  %v641_v14 = vmul.f32 %v1600_v42, %v2024_v26 }
 0x4e7   :  { %v633_v43 = vadd.f32 %v632_v9, %v1841_v24 }
 0x4e9   :  { %1601 = vtanh.f32 %v633_v43 }
 0x4f3   :  { %v1602_v46 = vpop.eup %1601 }
 0x4f4   :  { %637 = vrot.lane.b32.xlu0 %v1602_v46, %s1689_s15 }
 0x566   :  { %v638_v50 = vpop.permute.xlu0 %637 }
 0x567   :  { %v640_v52 = vmul.f32 %v638_v50, %v635_v49 }
 0x569   :  { %v2043_v57 = vadd.f32 %v641_v14, %v640_v52 }
 0x56b   :  { %644 = vrot.lane.b32.xlu1 %v2043_v57, %s1689_s15 }
 0x5dd   :  { %v645_v58 = vpop.permute.xlu1 %644 }
 0x5de   :  { %1380 = vmatmul.mubr.msk.f32.vlgmr.msra.gmra.mrb[6].mxu0 %vm454_vm2, %v645_v58 }
 0x5df   :  { %1514 = vmatpush1.bf16.msra.mxu0 %v1942_v44  ;;  %903 = vmatprep.mubr.f32.mxu0 %v1688_v0 }
 0x5e0   :  { %1516 = vmatprep.subr.bf16.mxu0 %v1944_v45 }
 0x5e3   :  { %1518 = vmatpush1.bf16.msra.mxu0 %v1961_v54 }
 0x5e4   :  { %1520 = vmatprep.subr.bf16.mxu0 %v1965_v55 }
 0x5e7   :  { %1522 = vmatpush1.bf16.msra.mxu0 %v1981_v61 }
 0x5e8   :  { %1524 = vmatprep.subr.bf16.mxu0 %v1985_v62 }
 0x5eb   :  { %1526 = vmatpush1.bf16.msra.mxu0 %v1996_v4 }
 0x5ec   :  { %1544 = vmatprep.subr.bf16.mxu0 %v1931_v39 }
 0x6b1   :  { %v714_v24 = vpop.f32.mrb[6].mxu0 }
 0x6b2   :  { %v719_v59 = vadd.f32 %v714_v24, %v1846_v31  ;;  %v716_v60 = vpop.f32.mrb[7].mxu0 }
 0x6b3   :  { %v726_v5 = vadd.f32 %v1918_v30, %v716_v60 }
 0x6b4   :  { %v1381_v63 = vmul.f32 -1.442695, %v719_v59 }
 0x6b6   :  { %1603 = vpow2.f32 %v1381_v63 }
 0x6c0   :  { %v1604_v2 = vpop.eup %1603 }
 0x6c1   :  { %v723_v3 = vadd.f32 1.0, %v1604_v2 }
 0x6c3   :  { %1605 = vrcp.f32 %v723_v3 }
 0x6cd   :  { %v1606_v6 = vpop.eup %1605 }
 0x6ce   :  { %v727_v11 = vmul.f32 %v1606_v6, %v726_v5  ;;  %v730_v39 = vsub.f32 1.0, %v1606_v6  ;;  %v736_v31 = vmul.f32 %v1606_v6, %v2043_v57 }
 0x6d0   :  { %v728_v12 = vadd.f32 %v727_v11, %v1855_v40 }
 0x6d2   :  { %1607 = vtanh.f32 %v728_v12 }
 0x6dc   :  { %v1608_v13 = vpop.eup %1607 }
 0x6dd   :  { %732 = vrot.lane.b32.xlu0 %v1608_v13, %s1689_s15 }
 0x74f   :  { %v733_v16 = vpop.permute.xlu0 %732 }
 0x750   :  { %v735_v17 = vmul.f32 %v733_v16, %v730_v39  ;;  %v547_v16 = vmax.f32 %v2005_v8, %v2024_v26  ;;  %v1173_v26 = vld [vmem:[%s2187_s5] sm:$0xff] }
 0x752   :  { %v2062_v19 = vadd.f32 %v736_v31, %v735_v17 }
 0x754   :  { %740 = vrot.lane.b32.xlu1 %v2062_v19, %s1689_s15  ;;  %v738_v39 = vmax.f32 %v2043_v57, %v2062_v19 }
 0x7c6   :  { %v741_v20 = vpop.permute.xlu1 %740 }
 0x7c7   :  { %1382 = vmatmul.mubr.msk.f32.vlgmr.msra.gmra.mrb[6].mxu1 %vm454_vm2, %v741_v20 }
 0x7c8   :  { %1530 = vmatpush1.bf16.msra.mxu1 %v1942_v44  ;;  %999 = vmatprep.mubr.f32.mxu1 %v1688_v0 }
 0x7c9   :  { %1532 = vmatprep.subr.bf16.mxu1 %v1944_v45 }
 0x7cc   :  { %1534 = vmatpush1.bf16.msra.mxu1 %v1961_v54 }
 0x7cd   :  { %1536 = vmatprep.subr.bf16.mxu1 %v1965_v55 }
 0x7d0   :  { %1538 = vmatpush1.bf16.msra.mxu1 %v1981_v61 }
 0x7d1   :  { %1540 = vmatprep.subr.bf16.mxu1 %v1985_v62 }
 0x7d4   :  { %1542 = vmatpush1.bf16.msra.mxu1 %v1996_v4 }
 0x89a   :  { %v810_v40 = vpop.f32.mrb[6].mxu1 }
 0x89b   :  { %v815_v21 = vadd.f32 %v810_v40, %v1864_v51  ;;  %v812_v23 = vpop.f32.mrb[7].mxu1 }
 0x89c   :  { %v822_v33 = vadd.f32 %v1918_v30, %v812_v23 }
 0x89d   :  { %v1383_v25 = vmul.f32 -1.442695, %v815_v21 }
 0x89f   :  { %1609 = vpow2.f32 %v1383_v25 }
 0x8a9   :  { %v1610_v27 = vpop.eup %1609 }
 0x8aa   :  { %v819_v28 = vadd.f32 1.0, %v1610_v27  ;;  %v1175_v27 = vld [vmem:[%s2187_s5 + $0x10] sm:$0xff] }
 0x8ac   :  { %1611 = vrcp.f32 %v819_v28  ;;  %v1690_v28 = vmov 0.0|0.0  }
 0x8ad   :  { %1559 = vmatprep.subr.bf16.mxu1 %v1690_v28 }
 0x8b6   :  { %v1612_v34 = vpop.eup %1611 }
 0x8b7   :  { %v823_v7 = vmul.f32 %v1612_v34, %v822_v33  ;;  %v826_v10 = vsub.f32 1.0, %v1612_v34  ;;  %v832_v51 = vmul.f32 %v1612_v34, %v2062_v19 }
 0x8b9   :  { %v824_v36 = vadd.f32 %v823_v7, %v1869_v56 }
 0x8bb   :  { %1613 = vtanh.f32 %v824_v36 }
 0x8c5   :  { %v1614_v41 = vpop.eup %1613 }
 0x8c6   :  { %828 = vrot.lane.b32.xlu0 %v1614_v41, %s1689_s15  ;;  %v1177_v41 = vld [vmem:[%s2187_s5 + $0x20] sm:$0xff] }
 0x938   :  { %v829_v47 = vpop.permute.xlu0 %828 }
 0x939   :  { %v831_v48 = vmul.f32 %v829_v47, %v826_v10  ;;  %v1178_v10 = vld [vmem:[%s2187_s5 + $0x28] sm:$0xff]  ;;  %v1179_v47 = vld [vmem:[%s2187_s5 + $0x30] sm:$0xff] }
 0x93b   :  { %v2080_v53 = vadd.f32 %v832_v51, %v831_v48  ;;  %v1566_v48 = vpack.c.bf16 %v1178_v10, %v1177_v41 }
 0x93d   :  { %835 = vrot.lane.b32.xlu1 %v2080_v53, %s1689_s15 }
 0x9af   :  { %v836_v29 = vpop.permute.xlu1 %835 }
 0x9b0   :  { %1384 = vmatmul.mubr.msk.f32.vlgmr.msra.gmra.mrb[8].mxu0 %vm454_vm2, %v836_v29 }
 0x9b1   :  { %1546 = vmatpush1.bf16.msra.mxu0 %v1942_v44  ;;  %1094 = vmatprep.mubr.f32.mxu0 %v1688_v0 }
 0x9b2   :  { %1548 = vmatprep.subr.bf16.mxu0 %v1944_v45 }
 0x9b5   :  { %1550 = vmatpush1.bf16.msra.mxu0 %v1961_v54 }
 0x9b6   :  { %1552 = vmatprep.subr.bf16.mxu0 %v1965_v55 }
 0x9b9   :  { %1554 = vmatpush1.bf16.msra.mxu0 %v1981_v61 }
 0x9ba   :  { %1556 = vmatprep.subr.bf16.mxu0 %v1985_v62 }
 0x9bd   :  { %1558 = vmatpush1.bf16.msra.mxu0 %v1996_v4 }
 0x9be   :  { %1571 = vmatprep.subr.bf16.mxu0 %v1690_v28 }
 0xa83   :  { %v905_v56 = vpop.f32.mrb[8].mxu0 }
 0xa84   :  { %v910_v32 = vadd.f32 %v905_v56, %v1878_v1  ;;  %v907_v38 = vpop.f32.mrb[9].mxu0 }
 0xa85   :  { %v917_v45 = vadd.f32 %v1918_v30, %v907_v38  ;;  %v1262_v38 = vld [vmem:[%s2189_s7] sm:$0xff] }
 0xa86   :  { %v1385_v42 = vmul.f32 -1.442695, %v910_v32 }
 0xa88   :  { %1615 = vpow2.f32 %v1385_v42  ;;  %v1263_v42 = vld [vmem:[%s2189_s7 + $0x8] sm:$0xff] }
 0xa92   :  { %v1616_v44 = vpop.eup %1615 }
 0xa93   :  { %v914_v9 = vadd.f32 1.0, %v1616_v44 }
 0xa95   :  { %1617 = vrcp.f32 %v914_v9  ;;  %v1572_v9 = vpack.c.bf16 %v1263_v42, %v1262_v38 }
 0xa9f   :  { %v1618_v54 = vpop.eup %1617 }
 0xaa0   :  { %v918_v43 = vmul.f32 %v1618_v54, %v917_v45  ;;  %v921_v62 = vsub.f32 1.0, %v1618_v54  ;;  %v927_v1 = vmul.f32 %v1618_v54, %v2080_v53 }
 0xaa2   :  { %v919_v55 = vadd.f32 %v918_v43, %v1887_v15 }
 0xaa4   :  { %1619 = vtanh.f32 %v919_v55 }
 0xaae   :  { %v1620_v61 = vpop.eup %1619 }
 0xaaf   :  { %923 = vrot.lane.b32.xlu0 %v1620_v61, %s1689_s15 }
 0xb21   :  { %v924_v4 = vpop.permute.xlu0 %923 }
 0xb22   :  { %v926_v46 = vmul.f32 %v924_v4, %v921_v62 }
 0xb24   :  { %v928_v49 = vadd.f32 %v927_v1, %v926_v46 }
 0xb26   :  { %931 = vrot.lane.b32.xlu1 %v928_v49, %s1689_s15  ;;  %v929_v7 = vmax.f32 %v2080_v53, %v928_v49  ;;  %v1180_v53 = vld [vmem:[%s2187_s5 + $0x38] sm:$0xff] }
 0xb27   :  { %v1569_v32 = vpack.c.bf16 %v1180_v53, %v1179_v47 }
 0xb98   :  { %v932_v50 = vpop.permute.xlu1 %931 }
 0xb99   :  { %1386 = vmatmul.mubr.msk.f32.vlgmr.msra.gmra.mrb[8].mxu1 %vm454_vm2, %v932_v50 }
 0xb9a   :  { %1425 = vmatprep.mubr.msk.f32.mxu1 %vm1691_vm3, %v1688_v0 }
 0xc6c   :  { %v1001_v14 = vpop.f32.mrb[8].mxu1 }
 0xc6d   :  { %v1006_v52 = vadd.f32 %v1001_v14, %v1892_v18  ;;  %v1003_v58 = vpop.f32.mrb[9].mxu1 }
 0xc6e   :  { %v1013_v60 = vadd.f32 %v1918_v30, %v1003_v58 }
 0xc6f   :  { %v1387_v15 = vmul.f32 -1.442695, %v1006_v52 }
 0xc71   :  { %1621 = vpow2.f32 %v1387_v15 }
 0xc7b   :  { %v1622_v24 = vpop.eup %1621 }
 0xc7c   :  { %v1010_v59 = vadd.f32 1.0, %v1622_v24 }
 0xc7e   :  { %1623 = vrcp.f32 %v1010_v59 }
 0xc88   :  { %v1624_v63 = vpop.eup %1623 }
 0xc89   :  { %v1014_v2 = vmul.f32 %v1624_v63, %v1013_v60  ;;  %v1017_v6 = vsub.f32 1.0, %v1624_v63  ;;  %v1023_v12 = vmul.f32 %v1624_v63, %v928_v49 }
 0xc8b   :  { %v1015_v3 = vadd.f32 %v1014_v2, %v1898_v22 }
 0xc8d   :  { %1625 = vtanh.f32 %v1015_v3 }
 0xc97   :  { %v1626_v5 = vpop.eup %1625 }
 0xc98   :  { %1019 = vrot.lane.b32.xlu0 %v1626_v5, %s1689_s15 }
 0xd0a   :  { %v1020_v11 = vpop.permute.xlu0 %1019 }
 0xd0b   :  { %v1022_v18 = vmul.f32 %v1020_v11, %v1017_v6  ;;  %v1264_v6 = vld [vmem:[%s2189_s7 + $0x10] sm:$0xff]  ;;  %v1265_v11 = vld [vmem:[%s2189_s7 + $0x18] sm:$0xff]  ;;  %s1692_s7 = smov [#allocation5]  }
 0xd0d   :  { %v1024_v13 = vadd.f32 %v1023_v12, %v1022_v18  ;;  %v1575_v12 = vpack.c.bf16 %v1265_v11, %v1264_v6  ;;  %v1390_v18 = vld [vmem:[%s2188_s6] ss:$0 sm:$0xff]  ;;  %s1360_s6 = sshll.u32 %s1692_s7, 4  ;;  %s1361_s6 = int_to_ptr.vmem [resolvable:$true] %s1360_s6 }
 0xd0e   :  { %s1659_s16 = scalar_lea.vmem %s1361_s6, 128  ;;  %p1664_p9 = scmp.lt.s32.totalorder %s1361_s6, %s1361_s6 }
 0xd0f   :  { %1026 = vrot.lane.b32.xlu1 %v1024_v13, %s1689_s15  ;;  %p1660_p8 = scmp.ne.s32.totalorder %s1361_s6, %s1659_s16  ;;  %p1665_p10 = scmp.lt.s32.totalorder %s1659_s16, %s1659_s16 }
 0xd11   :  { %p1666_p11 = por %p1665_p10, %p1664_p9 }
 0xd13   :  { %1132 = vrot.lane.b32.xlu1 %v738_v39, %s1689_s15  ;;  %p1667_p12 = pnand %p1666_p11, %p1660_p8 }
 0xd17   :  { %1122 = vrot.lane.b32.xlu1 %v547_v16, %s1689_s15 }
 0xd81   :  { %v1027_v22 = vpop.permute.xlu1 %1026 }
 0xd82   :  { %1388 = vmatmul.mubr.msk.f32.vlgmr.msra.gmra.mrb[10].mxu0 %vm454_vm2, %v1027_v22 }
 0xd83   :  { %1436 = vmatprep.mubr.msk.f32.mxu0 %vm1691_vm3, %v1688_v0  ;;  %1573 = vmatpush3.bf16.msra.mxu0 %v1572_v9 }
 0xd84   :  { %1574 = vmatprep.subr.bf16.mxu0 %v1690_v28 }
 0xd85   :  { %v1133_v0 = vpop.permute.xlu1 %1132 }
 0xd87   :  { %1576 = vmatpush3.bf16.msra.mxu0 %v1575_v12 }
 0xd89   :  { %v1123_v61 = vpop.permute.xlu1 %1122 }
 0xe55   :  { %v1096_v31 = vpop.f32.mrb[10].mxu0 }
 0xe56   :  { %v1101_v17 = vadd.f32 %v1096_v31, %v1908_v35  ;;  %v1098_v20 = vpop.f32.mrb[11].mxu0  ;;  %v1174_v35 = vld [vmem:[%s2187_s5 + $0x8] sm:$0xff]  ;;  %v1392_v31 = vld [vmem:[%s2190_s8] ss:$0 sm:$0xff] }
 0xe57   :  { %v1108_v57 = vadd.f32 %v1918_v30, %v1098_v20  ;;  %v1560_v30 = vpack.c.bf16 %v1174_v35, %v1173_v26 }
 0xe58   :  { %v1389_v40 = vmul.f32 -1.442695, %v1101_v17 }
 0xe59   :  { %1561 = vmatpush3.bf16.msra.mxu1 %v1560_v30 }
 0xe5a   :  { %1627 = vpow2.f32 %v1389_v40  ;;  %1562 = vmatprep.subr.bf16.mxu1 %v1690_v28 }
 0xe64   :  { %v1628_v21 = vpop.eup %1627 }
 0xe65   :  { %v1105_v23 = vadd.f32 1.0, %v1628_v21 }
 0xe67   :  { %1629 = vrcp.f32 %v1105_v23 }
 0xe71   :  { %v1630_v19 = vpop.eup %1629 }
 0xe72   :  { %v1109_v25 = vmul.f32 %v1630_v19, %v1108_v57  ;;  %v1112_v36 = vsub.f32 1.0, %v1630_v19  ;;  %v1118_v29 = vmul.f32 %v1630_v19, %v1024_v13 }
 0xe74   :  { %v1110_v8 = vadd.f32 %v1109_v25, %v1913_v37  ;;  %v1176_v37 = vld [vmem:[%s2187_s5 + $0x18] sm:$0xff] }
 0xe75   :  { %v1563_v33 = vpack.c.bf16 %v1176_v37, %v1175_v27 }
 0xe76   :  { %1631 = vtanh.f32 %v1110_v8 }
 0xe77   :  { %1564 = vmatpush3.bf16.msra.mxu1 %v1563_v33 }
 0xe78   :  { %1565 = vmatprep.subr.bf16.mxu1 %v1690_v28 }
 0xe7b   :  { %1567 = vmatpush3.bf16.msra.mxu1 %v1566_v48 }
 0xe7c   :  { %1568 = vmatprep.subr.bf16.mxu1 %v1690_v28 }
 0xe7f   :  { %1570 = vmatpush3.bf16.msra.mxu1 %v1569_v32 }
 0xe80   :  { %v1632_v34 = vpop.eup %1631 }
 0xe81   :  { %1114 = vrot.lane.b32.xlu0 %v1632_v34, %s1689_s15 }
 0xe85   :  { %1136 = vrot.lane.b32.xlu0 %v929_v7, %s1689_s15 }
 0xef3   :  { %v1115_v51 = vpop.permute.xlu0 %1114 }
 0xef4   :  { %v1117_v56 = vmul.f32 %v1115_v51, %v1112_v36 }
 0xef6   :  { %v1119_v44 = vadd.f32 %v1118_v29, %v1117_v56 }
 0xef7   :  { %v1137_v54 = vpop.permute.xlu0 %1136 }
 0xef8   :  { %v1120_v45 = vmax.f32 %v1024_v13, %v1119_v44  ;;  %v1139_v43 = vsel %vm1129_vm4, %v1133_v0, %v1137_v54  ;;  %v1140_v55 = vsel %vm1129_vm4, %v1137_v54, %v1133_v0 }
 0xef9   :  { %v1143_v62 = vrot.slane %v1139_v43, 7  ;;  %v1146_v1 = vrot.slane %v1140_v55, 6  ;;  %v1154_v15 = vrot.slane %v1139_v43, 4  ;;  %v1156_v59 = vrot.slane %v1140_v55, 3 }
 0xefa   :  { %1126 = vrot.lane.b32.xlu0 %v1120_v45, %s1689_s15 }
 0xf6c   :  { %v1127_v4 = vpop.permute.xlu0 %1126 }
 0xf6d   :  { %v1130_v46 = vsel %vm1129_vm4, %v1123_v61, %v1127_v4  ;;  %v1141_v49 = vsel %vm1129_vm4, %v1127_v4, %v1123_v61 }
 0xf6e   :  { %v1149_v50 = vrot.slane %v1141_v49, 5  ;;  %v1152_v14 = vrot.slane %v1130_v46, 5  ;;  %v1160_v52 = vsel %vm273_vm1, %v1130_v46, %v1143_v62  ;;  %v1158_v63 = vrot.slane %v1141_v49, 2 }
 0xf6f   :  { %v1162_v58 = vsel %vm1161_vm5, %v1160_v52, %v1146_v1 }
 0xf70   :  { %v1164_v24 = vsel %vm1163_vm6, %v1162_v58, %v1149_v50 }
 0xf71   :  { %v1166_v60 = vsel %vm1165_vm7, %v1164_v24, %v1152_v14 }
 0xf72   :  { %v1168_v2 = vsel %vm1167_vm8, %v1166_v60, %v1154_v15 }
 0xf73   :  { %v1170_v3 = vsel %vm1169_vm9, %v1168_v2, %v1156_v59 }
 0xf74   :  { %v1172_v5 = vsel %vm1171_vm10, %v1170_v3, %v1158_v63 }
 0xf75   :  { %1426 = vmatmul.mubr.msk.f32.vlgmr.msra.gmra.mrb[10].mxu1 %vm454_vm2, %v1172_v5 }
0x1048   :  { %v1257_v13 = vpop.f32.mrb[10].mxu1 }
0x1049   :  { %v1258_v39 = vadd.f32 %v1390_v18, %v1257_v13  ;;  %v1427_v16 = vpop.f32.mrb[11].mxu1 }
0x104b   :  { %v1261_v22 = vmax.f32 %v1258_v39, 0.0 }
0x104d   :  { %1437 = vmatmul.mubr.msk.f32.vlgmr.msra.gmra.mrb[12].mxu0 %vm1129_vm4, %v1261_v22 }
0x1120   :  { %v1342_v17 = vpop.f32.mrb[12].mxu0 }
0x1121   :  { %v1343_v20 = vadd.f32 %v1392_v31, %v1342_v17  ;;  %v1438_v40 = vpop.f32.mrb[13].mxu0 }
0x1123   :  { %v1394_v21 = vmul.f32 -1.442695, %v1343_v20 }
0x1125   :  { %1633 = vpow2.f32 %v1394_v21 }
0x112f   :  { %v1634_v23 = vpop.eup %1633 }
0x1130   :  { %v1349_v57 = vadd.f32 1.0, %v1634_v23 }
0x1132   :  { %1635 = vrcp.f32 %v1349_v57 }
0x113c   :  { %v1636_v19 = vpop.eup %1635 }
0x113d   :  { %1353 = vst.msk [vmem:[#allocation5] sm:$0xff] %vm1352_vm11, %v1636_v19 }
0x113e   :  { %1670 = shalt.err (!%p1667_p12)
}
0x113f   :  { %s1671_s18 = scalar_lea.hbm %s2191_s9, 128 }
0x1140   :  { %p1672_p13 = scmp.ne.s32.totalorder %s2191_s9, %s1671_s18  ;;  %p1675_p0 = scmp.lt.u32.totalorder %s1671_s18, %s2191_s9 }
0x1142   :  { %p1677_p1 = pnand %p1675_p0, %p1672_p13 }
0x1144   :  { %1680 = shalt.err (!%p1677_p1)
}
0x1145   :  { %1363 = dma.vmem_to_hbm [thread:$0]  %s1361_s6, 128, %s2191_s9, [#allocation4]  }
0x1146   :  { %1683 = dma.done.wait [#allocation4], 128  }
0x1147   :  { %1684 = vsyncadd [#allocation4], 4294967168 }
0x1148   :  { %1367 = vsyncpa [#allocation3], 1 }
0x1149   :  { %1368 = vsyncpa [#allocation4], 1 }

</bundles_post_ra>
